<compile_context>
chip_gen: v6e
topology: v6e:2x2x1
jax: 0.10.0
libtpu: 0.0.40
codegen_flags: <defaults>
</compile_context>

<pallas_src>
import jax
import jax.numpy as jnp
from jax.experimental import pallas as pl
from jax.experimental.pallas import tpu as pltpu

INPUT_SIZE = 28 * 28          # 784, forced by x.view(-1, 28*28)
PADDED_IN = 896               # 7 * 128  (lane-aligned feature dim)
HIDDEN_1 = 128
HIDDEN_2 = 64
PADDED_H2 = 128               # lane-aligned hidden_2
NUM_LAYERS = 2                # number_of_layers in the reference script
NUM_CLASSES = 10
PADDED_CLASSES = 128          # lane-dense output block; slice [:, :10] outside
BATCH_TILE = 256              # MXU-filling batch tile for large batches


def _fused_mlp_kernel(x_ref,
                      w1_ref, b1_ref,
                      w2_ref, b2_ref,
                      w3_ref, b3_ref,
                      wh_ref, bh_ref,
                      out_ref):
    """Whole SequentialNeuralNet forward for one batch tile, fully in VMEM.

    x / weights are bf16 (padded, pre-transposed); biases f32. Activations are
    cast to bf16 just before each matmul; accumulation is f32 on the MXU.
    """
    h = x_ref[...]                                            # (Bt, 896) bf16

    # Unrolled loop over the stacked NeuralNet blocks (static indices).
    for layer in range(NUM_LAYERS):
        a1 = jnp.dot(h.astype(jnp.bfloat16), w1_ref[layer],
                     preferred_element_type=jnp.float32) + b1_ref[layer]
        a1 = jnp.maximum(a1, 0.0)                             # ReLU  (Bt, 128)
        a2 = jnp.dot(a1.astype(jnp.bfloat16), w2_ref[layer],
                     preferred_element_type=jnp.float32) + b2_ref[layer]
        a2 = jnp.maximum(a2, 0.0)                             # ReLU  (Bt, 128) [cols 64: are 0]
        h = jnp.dot(a2.astype(jnp.bfloat16), w3_ref[layer],
                    preferred_element_type=jnp.float32) + b3_ref[layer]  # (Bt, 896), no ReLU

    # mlp_head: (Bt, 896) @ (896, 128) + (1, 128)   [cols 10: are exactly 0]
    logits = jnp.dot(h.astype(jnp.bfloat16), wh_ref[...],
                     preferred_element_type=jnp.float32) + bh_ref[...]
    out_ref[...] = logits


def _full_spec(shape):
    """BlockSpec covering a whole (small) weight array, constant over the grid."""
    return pl.BlockSpec(shape, lambda i: (0,) * len(shape))


def _pad2(a, rows, cols):
    """Zero-pad the last two dims of `a` up to (rows, cols)."""
    pad = [(0, 0)] * (a.ndim - 2) + [(0, rows - a.shape[-2]), (0, cols - a.shape[-1])]
    return jnp.pad(a, pad)


def _prepare_params(params):
    """Pad to lane-aligned shapes; weights -> bf16, biases stay f32."""
    w1 = _pad2(params["w1"], PADDED_IN, HIDDEN_1).astype(jnp.bfloat16)        # (L, 896, 128)
    b1 = params["b1"].astype(jnp.float32)                                     # (L, 1, 128)
    w2 = _pad2(params["w2"], HIDDEN_1, PADDED_H2).astype(jnp.bfloat16)        # (L, 128, 128)
    b2 = _pad2(params["b2"], 1, PADDED_H2).astype(jnp.float32)                # (L, 1, 128)
    w3 = _pad2(params["w3"], PADDED_H2, PADDED_IN).astype(jnp.bfloat16)       # (L, 128, 896)
    b3 = _pad2(params["b3"], 1, PADDED_IN).astype(jnp.float32)                # (L, 1, 896)
    wh = _pad2(params["wh"], PADDED_IN, PADDED_CLASSES).astype(jnp.bfloat16)  # (896, 128)
    bh = _pad2(params["bh"], 1, PADDED_CLASSES).astype(jnp.float32)           # (1, 128)
    return w1, b1, w2, b2, w3, b3, wh, bh


def _batch_tiling(b):
    """Pick (padded_batch, batch_tile) from the static batch size."""
    if b >= BATCH_TILE:
        b_pad = ((b + BATCH_TILE - 1) // BATCH_TILE) * BATCH_TILE
        return b_pad, BATCH_TILE
    b_pad = max(8, ((b + 7) // 8) * 8)   # single small tile, sublane-aligned
    return b_pad, b_pad


@jax.jit
def sequential_neural_net(x, params):
    """x: any shape that flattens to (B, 784); params: dict of stacked weights."""
    x2 = x.reshape(-1, INPUT_SIZE).astype(jnp.float32)        # PyTorch .view(-1, 784)
    b = x2.shape[0]
    b_pad, b_tile = _batch_tiling(b)
    # Zero-pad batch to a tile multiple and features to 896; cast to bf16 so the
    # kernel's dominant HBM read moves half the bytes (matmuls are bf16 anyway).
    x2 = jnp.pad(x2, ((0, b_pad - b), (0, PADDED_IN - INPUT_SIZE))).astype(jnp.bfloat16)

    w1, b1, w2, b2, w3, b3, wh, bh = _prepare_params(params)

    grid = (b_pad // b_tile,)   # >= 2 steps shards across both TCs on v7x

    out = pl.pallas_call(
        _fused_mlp_kernel,
        out_shape=jax.ShapeDtypeStruct((b_pad, PADDED_CLASSES), jnp.float32),
        grid_spec=pltpu.PrefetchScalarGridSpec(
            num_scalar_prefetch=0,
            grid=grid,
            in_specs=[
                pl.BlockSpec((b_tile, PADDED_IN), lambda i: (i, 0)),
                _full_spec(w1.shape), _full_spec(b1.shape),
                _full_spec(w2.shape), _full_spec(b2.shape),
                _full_spec(w3.shape), _full_spec(b3.shape),
                _full_spec(wh.shape), _full_spec(bh.shape),
            ],
            out_specs=pl.BlockSpec((b_tile, PADDED_CLASSES), lambda i: (i, 0)),
        ),
        compiler_params=pltpu.CompilerParams(
            dimension_semantics=("parallel",),
        ),
    )(x2, w1, b1, w2, b2, w3, b3, wh, bh)

    # Drop batch padding and the lane padding of the logits.
    return out[:b, :NUM_CLASSES]


def init_params(key):
    """Deterministic PyTorch-style (uniform +-1/sqrt(fan_in)) init, stacked over layers.

    Linear weights are pre-transposed to (in, out); semantics identical to
    y = x @ W.T + b of nn.Linear.
    """
    def linear(k, fan_in, fan_out):
        kw, kb = jax.random.split(k)
        bound = 1.0 / jnp.sqrt(fan_in)
        w_t = jax.random.uniform(kw, (fan_in, fan_out), jnp.float32, -bound, bound)
        bias = jax.random.uniform(kb, (1, fan_out), jnp.float32, -bound, bound)
        return w_t, bias

    keys = jax.random.split(key, NUM_LAYERS * 3 + 1)
    w1s, b1s, w2s, b2s, w3s, b3s = [], [], [], [], [], []
    for l in range(NUM_LAYERS):
        w1, b1 = linear(keys[3 * l + 0], INPUT_SIZE, HIDDEN_1)
        w2, b2 = linear(keys[3 * l + 1], HIDDEN_1, HIDDEN_2)
        w3, b3 = linear(keys[3 * l + 2], HIDDEN_2, INPUT_SIZE)
        w1s.append(w1); b1s.append(b1)
        w2s.append(w2); b2s.append(b2)
        w3s.append(w3); b3s.append(b3)
    wh, bh = linear(keys[-1], INPUT_SIZE, NUM_CLASSES)

    return {
        "w1": jnp.stack(w1s), "b1": jnp.stack(b1s),
        "w2": jnp.stack(w2s), "b2": jnp.stack(b2s),
        "w3": jnp.stack(w3s), "b3": jnp.stack(b3s),
        "wh": wh, "bh": bh,
    }


def _reference_forward(x, params, matmul_dtype=jnp.float32):
    """Pure-JAX reference mirroring the PyTorch module.

    matmul_dtype=bf16 mirrors the kernel's numerics (bf16 operands, f32 acc);
    f32 mirrors PyTorch fp32 semantics.
    """
    def mm(a, w):
        return jnp.dot(a.astype(matmul_dtype), w.astype(matmul_dtype),
                       preferred_element_type=jnp.float32)

    h = x.reshape(-1, INPUT_SIZE).astype(jnp.float32)
    for l in range(NUM_LAYERS):
        h = jnp.maximum(mm(h, params["w1"][l]) + params["b1"][l], 0.0)
        h = jnp.maximum(mm(h, params["w2"][l]) + params["b2"][l], 0.0)
        h = mm(h, params["w3"][l]) + params["b3"][l]
    return mm(h, params["wh"]) + params["bh"]


if __name__ == "__main__":
    key = jax.random.PRNGKey(0)
    k_x, k_p = jax.random.split(key)

    # Small MNIST-like input in NCHW: (batch=8, channels=1, 28, 28).
    x = jax.random.normal(k_x, (8, 1, 28, 28), dtype=jnp.float32)
    params = init_params(k_p)

    out = jax.block_until_ready(sequential_neural_net(x, params))
    assert out.shape == (8, NUM_CLASSES)

    # Strict check against a reference using the same bf16-operand / f32-acc numerics.
    ref_bf16 = _reference_forward(x, params, matmul_dtype=jnp.bfloat16)
    assert jnp.allclose(out, ref_bf16, atol=3e-3, rtol=3e-3), "mismatch vs bf16 reference"

    # Loose sanity check against the pure-f32 (PyTorch-like) reference.
    ref_f32 = _reference_forward(x, params, matmul_dtype=jnp.float32)
    assert jnp.allclose(out, ref_f32, atol=7.5e-2, rtol=7.5e-2), "mismatch vs f32 reference"

    print("KERNEL_OK")
</pallas_src>

<mosaic_0001>
module attributes {stable_mosaic.version = 11 : i64} {
  func.func @_fused_mlp_kernel(%arg0: i32, %arg1: memref<8x896xbf16, #tpu.memory_space<vmem>>, %arg2: memref<2x896x128xbf16, #tpu.memory_space<vmem>>, %arg3: memref<2x1x128xf32, #tpu.memory_space<vmem>>, %arg4: memref<2x128x128xbf16, #tpu.memory_space<vmem>>, %arg5: memref<2x1x128xf32, #tpu.memory_space<vmem>>, %arg6: memref<2x128x896xbf16, #tpu.memory_space<vmem>>, %arg7: memref<2x1x896xf32, #tpu.memory_space<vmem>>, %arg8: memref<896x128xbf16, #tpu.memory_space<vmem>>, %arg9: memref<1x128xf32, #tpu.memory_space<vmem>>, %arg10: memref<8x128xf32, #tpu.memory_space<vmem>>) attributes {dimension_semantics = [#tpu.dimension_semantics<parallel>], iteration_bounds = array<i64: 1>, scalar_prefetch = 0 : i64, scratch_operands = 0 : i64, tpu.core_type = #tpu.core_type<tc>, window_params = [{transform_indices = @transform_0, window_bounds = array<i64: 8, 896>}, {pipeline_mode = #tpu.pipeline_mode<synchronous>, transform_indices = @transform_1, window_bounds = array<i64: 2, 896, 128>}, {pipeline_mode = #tpu.pipeline_mode<synchronous>, transform_indices = @transform_2, window_bounds = array<i64: 2, 1, 128>}, {pipeline_mode = #tpu.pipeline_mode<synchronous>, transform_indices = @transform_3, window_bounds = array<i64: 2, 128, 128>}, {pipeline_mode = #tpu.pipeline_mode<synchronous>, transform_indices = @transform_4, window_bounds = array<i64: 2, 1, 128>}, {pipeline_mode = #tpu.pipeline_mode<synchronous>, transform_indices = @transform_5, window_bounds = array<i64: 2, 128, 896>}, {pipeline_mode = #tpu.pipeline_mode<synchronous>, transform_indices = @transform_6, window_bounds = array<i64: 2, 1, 896>}, {pipeline_mode = #tpu.pipeline_mode<synchronous>, transform_indices = @transform_7, window_bounds = array<i64: 896, 128>}, {pipeline_mode = #tpu.pipeline_mode<synchronous>, transform_indices = @transform_8, window_bounds = array<i64: 1, 128>}, {transform_indices = @transform_9, window_bounds = array<i64: 8, 128>}]} {
    %c0 = arith.constant 0 : index
    %c0_0 = arith.constant 0 : index
    %0 = vector.load %arg1[%c0, %c0_0] : memref<8x896xbf16, #tpu.memory_space<vmem>>, vector<8x896xbf16>
    %c0_1 = arith.constant 0 : index
    %c0_2 = arith.constant 0 : index
    %c0_3 = arith.constant 0 : index
    %1 = vector.load %arg2[%c0_1, %c0_2, %c0_3] : memref<2x896x128xbf16, #tpu.memory_space<vmem>>, vector<1x896x128xbf16>
    %2 = vector.shape_cast %1 : vector<1x896x128xbf16> to vector<896x128xbf16>
    %cst = arith.constant dense<0.000000e+00> : vector<8x128xf32>
    %3 = tpu.matmul %0, %2, %cst {dimension_numbers = #tpu.dot_dimension_numbers<[1], [0], [0], [1], [0, 0, 1, 1], [], []>} : vector<8x896xbf16>, vector<896x128xbf16>, vector<8x128xf32> -> vector<8x128xf32>
    %c0_4 = arith.constant 0 : index
    %c0_5 = arith.constant 0 : index
    %c0_6 = arith.constant 0 : index
    %4 = vector.load %arg3[%c0_4, %c0_5, %c0_6] : memref<2x1x128xf32, #tpu.memory_space<vmem>>, vector<1x1x128xf32>
    %5 = vector.shape_cast %4 : vector<1x1x128xf32> to vector<1x128xf32>
    %6 = vector.broadcast %5 : vector<1x128xf32> to vector<8x128xf32>
    %7 = arith.addf %3, %6 : vector<8x128xf32>
    %cst_7 = arith.constant 0.000000e+00 : f32
    %8 = vector.broadcast %cst_7 : f32 to vector<8x128xf32>
    %9 = arith.maximumf %7, %8 : vector<8x128xf32>
    %10 = arith.truncf %9 : vector<8x128xf32> to vector<8x128xbf16>
    %c0_8 = arith.constant 0 : index
    %c0_9 = arith.constant 0 : index
    %c0_10 = arith.constant 0 : index
    %11 = vector.load %arg4[%c0_8, %c0_9, %c0_10] : memref<2x128x128xbf16, #tpu.memory_space<vmem>>, vector<1x128x128xbf16>
    %12 = vector.shape_cast %11 : vector<1x128x128xbf16> to vector<128x128xbf16>
    %cst_11 = arith.constant dense<0.000000e+00> : vector<8x128xf32>
    %13 = tpu.matmul %10, %12, %cst_11 {dimension_numbers = #tpu.dot_dimension_numbers<[1], [0], [0], [1], [0, 0, 1, 1], [], []>} : vector<8x128xbf16>, vector<128x128xbf16>, vector<8x128xf32> -> vector<8x128xf32>
    %c0_12 = arith.constant 0 : index
    %c0_13 = arith.constant 0 : index
    %c0_14 = arith.constant 0 : index
    %14 = vector.load %arg5[%c0_12, %c0_13, %c0_14] : memref<2x1x128xf32, #tpu.memory_space<vmem>>, vector<1x1x128xf32>
    %15 = vector.shape_cast %14 : vector<1x1x128xf32> to vector<1x128xf32>
    %16 = vector.broadcast %15 : vector<1x128xf32> to vector<8x128xf32>
    %17 = arith.addf %13, %16 : vector<8x128xf32>
    %cst_15 = arith.constant 0.000000e+00 : f32
    %18 = vector.broadcast %cst_15 : f32 to vector<8x128xf32>
    %19 = arith.maximumf %17, %18 : vector<8x128xf32>
    %20 = arith.truncf %19 : vector<8x128xf32> to vector<8x128xbf16>
    %c0_16 = arith.constant 0 : index
    %c0_17 = arith.constant 0 : index
    %c0_18 = arith.constant 0 : index
    %21 = vector.load %arg6[%c0_16, %c0_17, %c0_18] : memref<2x128x896xbf16, #tpu.memory_space<vmem>>, vector<1x128x896xbf16>
    %22 = vector.shape_cast %21 : vector<1x128x896xbf16> to vector<128x896xbf16>
    %cst_19 = arith.constant dense<0.000000e+00> : vector<8x896xf32>
    %23 = tpu.matmul %20, %22, %cst_19 {dimension_numbers = #tpu.dot_dimension_numbers<[1], [0], [0], [1], [0, 0, 1, 1], [], []>} : vector<8x128xbf16>, vector<128x896xbf16>, vector<8x896xf32> -> vector<8x896xf32>
    %c0_20 = arith.constant 0 : index
    %c0_21 = arith.constant 0 : index
    %c0_22 = arith.constant 0 : index
    %24 = vector.load %arg7[%c0_20, %c0_21, %c0_22] : memref<2x1x896xf32, #tpu.memory_space<vmem>>, vector<1x1x896xf32>
    %25 = vector.shape_cast %24 : vector<1x1x896xf32> to vector<1x896xf32>
    %26 = vector.broadcast %25 : vector<1x896xf32> to vector<8x896xf32>
    %27 = arith.addf %23, %26 : vector<8x896xf32>
    %28 = arith.truncf %27 : vector<8x896xf32> to vector<8x896xbf16>
    %c1 = arith.constant 1 : index
    %c0_23 = arith.constant 0 : index
    %c0_24 = arith.constant 0 : index
    %29 = vector.load %arg2[%c1, %c0_23, %c0_24] : memref<2x896x128xbf16, #tpu.memory_space<vmem>>, vector<1x896x128xbf16>
    %30 = vector.shape_cast %29 : vector<1x896x128xbf16> to vector<896x128xbf16>
    %cst_25 = arith.constant dense<0.000000e+00> : vector<8x128xf32>
    %31 = tpu.matmul %28, %30, %cst_25 {dimension_numbers = #tpu.dot_dimension_numbers<[1], [0], [0], [1], [0, 0, 1, 1], [], []>} : vector<8x896xbf16>, vector<896x128xbf16>, vector<8x128xf32> -> vector<8x128xf32>
    %c1_26 = arith.constant 1 : index
    %c0_27 = arith.constant 0 : index
    %c0_28 = arith.constant 0 : index
    %32 = vector.load %arg3[%c1_26, %c0_27, %c0_28] : memref<2x1x128xf32, #tpu.memory_space<vmem>>, vector<1x1x128xf32>
    %33 = vector.shape_cast %32 : vector<1x1x128xf32> to vector<1x128xf32>
    %34 = vector.broadcast %33 : vector<1x128xf32> to vector<8x128xf32>
    %35 = arith.addf %31, %34 : vector<8x128xf32>
    %cst_29 = arith.constant 0.000000e+00 : f32
    %36 = vector.broadcast %cst_29 : f32 to vector<8x128xf32>
    %37 = arith.maximumf %35, %36 : vector<8x128xf32>
    %38 = arith.truncf %37 : vector<8x128xf32> to vector<8x128xbf16>
    %c1_30 = arith.constant 1 : index
    %c0_31 = arith.constant 0 : index
    %c0_32 = arith.constant 0 : index
    %39 = vector.load %arg4[%c1_30, %c0_31, %c0_32] : memref<2x128x128xbf16, #tpu.memory_space<vmem>>, vector<1x128x128xbf16>
    %40 = vector.shape_cast %39 : vector<1x128x128xbf16> to vector<128x128xbf16>
    %cst_33 = arith.constant dense<0.000000e+00> : vector<8x128xf32>
    %41 = tpu.matmul %38, %40, %cst_33 {dimension_numbers = #tpu.dot_dimension_numbers<[1], [0], [0], [1], [0, 0, 1, 1], [], []>} : vector<8x128xbf16>, vector<128x128xbf16>, vector<8x128xf32> -> vector<8x128xf32>
    %c1_34 = arith.constant 1 : index
    %c0_35 = arith.constant 0 : index
    %c0_36 = arith.constant 0 : index
    %42 = vector.load %arg5[%c1_34, %c0_35, %c0_36] : memref<2x1x128xf32, #tpu.memory_space<vmem>>, vector<1x1x128xf32>
    %43 = vector.shape_cast %42 : vector<1x1x128xf32> to vector<1x128xf32>
    %44 = vector.broadcast %43 : vector<1x128xf32> to vector<8x128xf32>
    %45 = arith.addf %41, %44 : vector<8x128xf32>
    %cst_37 = arith.constant 0.000000e+00 : f32
    %46 = vector.broadcast %cst_37 : f32 to vector<8x128xf32>
    %47 = arith.maximumf %45, %46 : vector<8x128xf32>
    %48 = arith.truncf %47 : vector<8x128xf32> to vector<8x128xbf16>
    %c1_38 = arith.constant 1 : index
    %c0_39 = arith.constant 0 : index
    %c0_40 = arith.constant 0 : index
    %49 = vector.load %arg6[%c1_38, %c0_39, %c0_40] : memref<2x128x896xbf16, #tpu.memory_space<vmem>>, vector<1x128x896xbf16>
    %50 = vector.shape_cast %49 : vector<1x128x896xbf16> to vector<128x896xbf16>
    %cst_41 = arith.constant dense<0.000000e+00> : vector<8x896xf32>
    %51 = tpu.matmul %48, %50, %cst_41 {dimension_numbers = #tpu.dot_dimension_numbers<[1], [0], [0], [1], [0, 0, 1, 1], [], []>} : vector<8x128xbf16>, vector<128x896xbf16>, vector<8x896xf32> -> vector<8x896xf32>
    %c1_42 = arith.constant 1 : index
    %c0_43 = arith.constant 0 : index
    %c0_44 = arith.constant 0 : index
    %52 = vector.load %arg7[%c1_42, %c0_43, %c0_44] : memref<2x1x896xf32, #tpu.memory_space<vmem>>, vector<1x1x896xf32>
    %53 = vector.shape_cast %52 : vector<1x1x896xf32> to vector<1x896xf32>
    %54 = vector.broadcast %53 : vector<1x896xf32> to vector<8x896xf32>
    %55 = arith.addf %51, %54 : vector<8x896xf32>
    %56 = arith.truncf %55 : vector<8x896xf32> to vector<8x896xbf16>
    %c0_45 = arith.constant 0 : index
    %c0_46 = arith.constant 0 : index
    %57 = vector.load %arg8[%c0_45, %c0_46] : memref<896x128xbf16, #tpu.memory_space<vmem>>, vector<896x128xbf16>
    %cst_47 = arith.constant dense<0.000000e+00> : vector<8x128xf32>
    %58 = tpu.matmul %56, %57, %cst_47 {dimension_numbers = #tpu.dot_dimension_numbers<[1], [0], [0], [1], [0, 0, 1, 1], [], []>} : vector<8x896xbf16>, vector<896x128xbf16>, vector<8x128xf32> -> vector<8x128xf32>
    %c0_48 = arith.constant 0 : index
    %c0_49 = arith.constant 0 : index
    %59 = vector.load %arg9[%c0_48, %c0_49] : memref<1x128xf32, #tpu.memory_space<vmem>>, vector<1x128xf32>
    %60 = vector.broadcast %59 : vector<1x128xf32> to vector<8x128xf32>
    %61 = arith.addf %58, %60 : vector<8x128xf32>
    %c0_50 = arith.constant 0 : index
    %c0_51 = arith.constant 0 : index
    %62 = vector.load %arg10[%c0_50, %c0_51] : memref<8x128xf32, #tpu.memory_space<vmem>>, vector<8x128xf32>
    tpu.vector_store %arg10[%c0_50, %c0_51], %61 {strides = array<i32>} : memref<8x128xf32, #tpu.memory_space<vmem>>, vector<8x128xf32>,
    return
  }
  func.func @transform_0(%arg0: i32) -> (i32, i32) {
    %c0_i32 = arith.constant 0 : i32
    %c0_i32_0 = arith.constant 0 : i32
    return %arg0, %c0_i32 : i32, i32
  }
  func.func @transform_1(%arg0: i32) -> (i32, i32, i32) {
    %c0_i32 = arith.constant 0 : i32
    %c0_i32_0 = arith.constant 0 : i32
    %c0_i32_1 = arith.constant 0 : i32
    %c0_i32_2 = arith.constant 0 : i32
    return %c0_i32, %c0_i32_0, %c0_i32_1 : i32, i32, i32
  }
  func.func @transform_2(%arg0: i32) -> (i32, i32, i32) {
    %c0_i32 = arith.constant 0 : i32
    %c0_i32_0 = arith.constant 0 : i32
    %c0_i32_1 = arith.constant 0 : i32
    %c0_i32_2 = arith.constant 0 : i32
    return %c0_i32, %c0_i32_0, %c0_i32_1 : i32, i32, i32
  }
  func.func @transform_3(%arg0: i32) -> (i32, i32, i32) {
    %c0_i32 = arith.constant 0 : i32
    %c0_i32_0 = arith.constant 0 : i32
    %c0_i32_1 = arith.constant 0 : i32
    %c0_i32_2 = arith.constant 0 : i32
    return %c0_i32, %c0_i32_0, %c0_i32_1 : i32, i32, i32
  }
  func.func @transform_4(%arg0: i32) -> (i32, i32, i32) {
    %c0_i32 = arith.constant 0 : i32
    %c0_i32_0 = arith.constant 0 : i32
    %c0_i32_1 = arith.constant 0 : i32
    %c0_i32_2 = arith.constant 0 : i32
    return %c0_i32, %c0_i32_0, %c0_i32_1 : i32, i32, i32
  }
  func.func @transform_5(%arg0: i32) -> (i32, i32, i32) {
    %c0_i32 = arith.constant 0 : i32
    %c0_i32_0 = arith.constant 0 : i32
    %c0_i32_1 = arith.constant 0 : i32
    %c0_i32_2 = arith.constant 0 : i32
    return %c0_i32, %c0_i32_0, %c0_i32_1 : i32, i32, i32
  }
  func.func @transform_6(%arg0: i32) -> (i32, i32, i32) {
    %c0_i32 = arith.constant 0 : i32
    %c0_i32_0 = arith.constant 0 : i32
    %c0_i32_1 = arith.constant 0 : i32
    %c0_i32_2 = arith.constant 0 : i32
    return %c0_i32, %c0_i32_0, %c0_i32_1 : i32, i32, i32
  }
  func.func @transform_7(%arg0: i32) -> (i32, i32) {
    %c0_i32 = arith.constant 0 : i32
    %c0_i32_0 = arith.constant 0 : i32
    %c0_i32_1 = arith.constant 0 : i32
    return %c0_i32, %c0_i32_0 : i32, i32
  }
  func.func @transform_8(%arg0: i32) -> (i32, i32) {
    %c0_i32 = arith.constant 0 : i32
    %c0_i32_0 = arith.constant 0 : i32
    %c0_i32_1 = arith.constant 0 : i32
    return %c0_i32, %c0_i32_0 : i32, i32
  }
  func.func @transform_9(%arg0: i32) -> (i32, i32) {
    %c0_i32 = arith.constant 0 : i32
    %c0_i32_0 = arith.constant 0 : i32
    return %arg0, %c0_i32 : i32, i32
  }
}

</mosaic_0001>

<bundles_post_ra>
// kernel: sequential_neural_net.1
= control target key start
LH: loop header
LB: loop body
LE: loop exit
PB: predicated region body
PF: predicated region fallthrough
CT: control target
= control target key end

     0   :  { %v4558_v39 = vmov 0.0   ;;  %vm4559_vm0 = vmmov 0   ;;  %s5679_s0 = inlined_call_operand.vmem [shape: bf16[8,896], index: 0, kind: input, shape index: {}]   ;;  %s5680_s1 = inlined_call_operand.vmem [shape: bf16[2,896,128], index: 1, kind: input, shape index: {}]   ;;  %s5681_s2 = inlined_call_operand.vmem [shape: f32[2,1,128], index: 2, kind: input, shape index: {}]   ;;  %s5682_s3 = inlined_call_operand.vmem [shape: bf16[2,128,128], index: 3, kind: input, shape index: {}]   ;;  %s5683_s4 = inlined_call_operand.vmem [shape: f32[2,1,128], index: 4, kind: input, shape index: {}]   ;;  %s5684_s5 = inlined_call_operand.vmem [shape: bf16[2,128,896], index: 5, kind: input, shape index: {}]   ;;  %s5685_s6 = inlined_call_operand.vmem [shape: f32[2,1,896], index: 6, kind: input, shape index: {}]   ;;  %s5686_s7 = inlined_call_operand.vmem [shape: bf16[896,128], index: 7, kind: input, shape index: {}]   ;;  %s5687_s8 = inlined_call_operand.vmem [shape: f32[1,128], index: 8, kind: input, shape index: {}]   ;;  %s5688_s9 = inlined_call_operand.hbm [shape: f32[8,128], index: 9, kind: output, shape index: {}]  }
   0x1   :  { %v4185_v0 = vld [vmem:[%s5680_s1 + $0x78] sm:$0xff]   ;;  %v4189_v4 = vld [vmem:[%s5680_s1 + $0x70] sm:$0xff]   ;;  %v4193_v8 = vld [vmem:[%s5680_s1 + $0x68] sm:$0xff]  }
   0x2   :  { %v4186_v1 = vld [vmem:[%s5680_s1 + $0xf8] sm:$0xff]   ;;  %3780 = vmatprep.subr.bf16.mxu0 %v4185_v0  ;;  %v4190_v5 = vld [vmem:[%s5680_s1 + $0xf0] sm:$0xff]   ;;  %v4194_v9 = vld [vmem:[%s5680_s1 + $0xe8] sm:$0xff]  }
   0x3   :  { %v4187_v2 = vld [vmem:[%s5680_s1 + $0x38] sm:$0xff]   ;;  %3802 = vmatprep.subr.bf16.mxu1 %v4186_v1  ;;  %v4191_v6 = vld [vmem:[%s5680_s1 + $0x30] sm:$0xff]   ;;  %v4195_v10 = vld [vmem:[%s5680_s1 + $0x28] sm:$0xff]  }
   0x4   :  { %v4188_v3 = vld [vmem:[%s5680_s1 + $0xb8] sm:$0xff]   ;;  %3781 = vmatpush3.bf16.msra.mxu0 %v4187_v2  ;;  %v4192_v7 = vld [vmem:[%s5680_s1 + $0xb0] sm:$0xff]   ;;  %v4196_v11 = vld [vmem:[%s5680_s1 + $0xa8] sm:$0xff]  }
   0x5   :  { %3803 = vmatpush3.bf16.msra.mxu1 %v4188_v3  ;;  %3782 = vmatprep.subr.bf16.mxu0 %v4189_v4  ;;  %v4197_v12 = vld [vmem:[%s5680_s1 + $0x60] sm:$0xff]   ;;  %v4201_v16 = vld [vmem:[%s5680_s1 + $0x58] sm:$0xff]   ;;  %v4205_v20 = vld [vmem:[%s5680_s1 + $0x50] sm:$0xff]  }
   0x6   :  { %3804 = vmatprep.subr.bf16.mxu1 %v4190_v5  ;;  %v4198_v13 = vld [vmem:[%s5680_s1 + $0xe0] sm:$0xff]   ;;  %v4202_v17 = vld [vmem:[%s5680_s1 + $0xd8] sm:$0xff]   ;;  %v4206_v21 = vld [vmem:[%s5680_s1 + $0xd0] sm:$0xff]  }
   0x7   :  { %v4199_v14 = vld [vmem:[%s5680_s1 + $0x20] sm:$0xff]   ;;  %v4203_v18 = vld [vmem:[%s5680_s1 + $0x18] sm:$0xff]   ;;  %v4207_v22 = vld [vmem:[%s5680_s1 + $0x10] sm:$0xff]  }
   0x8   :  { %3783 = vmatpush3.bf16.msra.mxu0 %v4191_v6  ;;  %v4200_v15 = vld [vmem:[%s5680_s1 + $0xa0] sm:$0xff]   ;;  %v4204_v19 = vld [vmem:[%s5680_s1 + $0x98] sm:$0xff]   ;;  %v4208_v23 = vld [vmem:[%s5680_s1 + $0x90] sm:$0xff]  }
   0x9   :  { %3805 = vmatpush3.bf16.msra.mxu1 %v4192_v7  ;;  %3784 = vmatprep.subr.bf16.mxu0 %v4193_v8  ;;  %v4209_v24 = vld [vmem:[%s5680_s1 + $0x48] sm:$0xff]   ;;  %v4213_v28 = vld [vmem:[%s5680_s1 + $0x40] sm:$0xff]   ;;  %v4221_v38 = vld [vmem:[%s5680_s1 + $0x178] sm:$0xff]  }
   0xa   :  { %3806 = vmatprep.subr.bf16.mxu1 %v4194_v9  ;;  %v4210_v25 = vld [vmem:[%s5680_s1 + $0xc8] sm:$0xff]   ;;  %v4214_v29 = vld [vmem:[%s5680_s1 + $0xc0] sm:$0xff]   ;;  %v4222_v40 = vld [vmem:[%s5680_s1 + $0x138] sm:$0xff]  }
   0xb   :  { %v4211_v26 = vld [vmem:[%s5680_s1 + $0x8] sm:$0xff]   ;;  %v4215_v30 = vld [vmem:[%s5680_s1] sm:$0xff]   ;;  %v4223_v41 = vld [vmem:[%s5680_s1 + $0x1b8] sm:$0xff]  }
   0xc   :  { %3785 = vmatpush3.bf16.msra.mxu0 %v4195_v10  ;;  %v4212_v27 = vld [vmem:[%s5680_s1 + $0x88] sm:$0xff]   ;;  %v4216_v31 = vld [vmem:[%s5680_s1 + $0x80] sm:$0xff]   ;;  %v4224_v42 = vld [vmem:[%s5680_s1 + $0x170] sm:$0xff]  }
   0xd   :  { %3807 = vmatpush3.bf16.msra.mxu1 %v4196_v11  ;;  %3786 = vmatprep.subr.bf16.mxu0 %v4197_v12  ;;  %v34_v32 = vld [vmem:[%s5679_s0] sm:$0xff]  ;;  %v35_v33 = vld [vmem:[%s5679_s0 + $0x8] sm:$0xff]  ;;  %v4225_v43 = vld [vmem:[%s5680_s1 + $0x130] sm:$0xff]  }
   0xe   :  { %3808 = vmatprep.subr.bf16.mxu1 %v4198_v13  ;;  %v3278_v34 = vcombine.low %v34_v32, %v34_v32  ;;  %v3279_v35 = vcombine.high %v34_v32, %v34_v32  ;;  %v3280_v36 = vcombine.low %v35_v33, %v35_v33  ;;  %v3281_v37 = vcombine.high %v35_v33, %v35_v33  ;;  %v4226_v44 = vld [vmem:[%s5680_s1 + $0x1b0] sm:$0xff]   ;;  %v4227_v45 = vld [vmem:[%s5680_s1 + $0x168] sm:$0xff]   ;;  %v4230_v48 = vld [vmem:[%s5680_s1 + $0x160] sm:$0xff]  }
   0xf   :  { %v4228_v46 = vld [vmem:[%s5680_s1 + $0x128] sm:$0xff]   ;;  %v4231_v49 = vld [vmem:[%s5680_s1 + $0x120] sm:$0xff]   ;;  %v4233_v51 = vld [vmem:[%s5680_s1 + $0x158] sm:$0xff]  }
  0x10   :  { %3787 = vmatpush3.bf16.msra.mxu0 %v4199_v14  ;;  %550 = vmatprep.mubr.bf16.mxu0 %v3279_v35  ;;  %v4229_v47 = vld [vmem:[%s5680_s1 + $0x1a8] sm:$0xff]   ;;  %v4232_v50 = vld [vmem:[%s5680_s1 + $0x1a0] sm:$0xff]   ;;  %v4234_v52 = vld [vmem:[%s5680_s1 + $0x118] sm:$0xff]  }
  0x11   :  { %3809 = vmatpush3.bf16.msra.mxu1 %v4200_v15  ;;  %3788 = vmatprep.subr.bf16.mxu0 %v4201_v16  ;;  %v4235_v53 = vld [vmem:[%s5680_s1 + $0x198] sm:$0xff]   ;;  %v4236_v54 = vld [vmem:[%s5680_s1 + $0x150] sm:$0xff]   ;;  %v4239_v57 = vld [vmem:[%s5680_s1 + $0x148] sm:$0xff]  }
  0x12   :  { %3810 = vmatprep.subr.bf16.mxu1 %v4202_v17  ;;  %590 = vmatprep.mubr.bf16.mxu1 %v3281_v37  ;;  %v4237_v55 = vld [vmem:[%s5680_s1 + $0x110] sm:$0xff]   ;;  %v4240_v58 = vld [vmem:[%s5680_s1 + $0x108] sm:$0xff]   ;;  %v4242_v61 = vld [vmem:[%s5680_s1 + $0x140] sm:$0xff]  }
  0x13   :  { %v4238_v56 = vld [vmem:[%s5680_s1 + $0x190] sm:$0xff]   ;;  %v4241_v59 = vld [vmem:[%s5680_s1 + $0x188] sm:$0xff]   ;;  %v4243_v63 = vld [vmem:[%s5680_s1 + $0x100] sm:$0xff]  }
  0x14   :  { %3789 = vmatpush3.bf16.msra.mxu0 %v4203_v18  ;;  %v36_v60 = vld [vmem:[%s5679_s0 + $0x10] sm:$0xff]  ;;  %v4244_v0 = vld [vmem:[%s5680_s1 + $0x180] sm:$0xff]   ;;  %v4247_v1 = vld [vmem:[%s5679_s0 + $0x18] ss:$0 sps:$4 sm:$0xff]  }
  0x15   :  { %3811 = vmatpush3.bf16.msra.mxu1 %v4204_v19  ;;  %3790 = vmatprep.subr.bf16.mxu0 %v4205_v20  ;;  %v3283_v62 = vcombine.high %v36_v60, %v36_v60  ;;  %v3282_v2 = vcombine.low %v36_v60, %v36_v60  ;;  %v4248_v3 = vld [vmem:[%s5682_s3 + $0x38] sm:$0xff]   ;;  %v4249_v4 = vld [vmem:[%s5682_s3 + $0x30] sm:$0xff]   ;;  %v4250_v5 = vld [vmem:[%s5682_s3 + $0x28] sm:$0xff]  }
  0x16   :  { %3812 = vmatprep.subr.bf16.mxu1 %v4206_v21  ;;  %v4251_v6 = vld [vmem:[%s5682_s3 + $0x20] sm:$0xff]   ;;  %v4252_v7 = vld [vmem:[%s5682_s3 + $0x18] sm:$0xff]   ;;  %v4253_v8 = vld [vmem:[%s5682_s3 + $0x10] sm:$0xff]  }
  0x17   :  { %v4254_v9 = vld [vmem:[%s5682_s3 + $0x8] sm:$0xff]   ;;  %v4255_v10 = vld [vmem:[%s5682_s3] sm:$0xff]   ;;  %v4261_v13 = vld [vmem:[%s5684_s5 + $0x194] ss:$28 sps:$4 sm:$0xff]  }
  0x18   :  { %3791 = vmatpush3.bf16.msra.mxu0 %v4207_v22  ;;  %v4256_v11 = vld [vmem:[%s5684_s5 + $0x188] ss:$28 sps:$4 sm:$0xff]   ;;  %v4264_v14 = vld [vmem:[%s5684_s5 + $0x154] ss:$28 sps:$4 sm:$0xff]   ;;  %v4270_v16 = vld [vmem:[%s5684_s5 + $0x11c] ss:$28 sps:$4 sm:$0xff]  }
  0x19   :  { %3813 = vmatpush3.bf16.msra.mxu1 %v4208_v23  ;;  %3792 = vmatprep.subr.bf16.mxu0 %v4209_v24  ;;  %v4258_v12 = vld [vmem:[%s5684_s5 + $0x18c] ss:$28 sps:$4 sm:$0xff]   ;;  %v4268_v17 = vld [vmem:[%s5684_s5 + $0x118] ss:$28 sps:$4 sm:$0xff]   ;;  %v4276_v18 = vld [vmem:[%s5684_s5 + $0xe4] ss:$28 sps:$4 sm:$0xff]  }
  0x1a   :  { %3814 = vmatprep.subr.bf16.mxu1 %v4210_v25  ;;  %v4262_v15 = vld [vmem:[%s5684_s5 + $0x150] ss:$28 sps:$4 sm:$0xff]   ;;  %v4274_v19 = vld [vmem:[%s5684_s5 + $0xe0] ss:$28 sps:$4 sm:$0xff]   ;;  %v4280_v21 = vld [vmem:[%s5684_s5 + $0xa8] ss:$28 sps:$4 sm:$0xff]  }
  0x1b   :  { %v4282_v20 = vld [vmem:[%s5684_s5 + $0xac] ss:$28 sps:$4 sm:$0xff]   ;;  %v4288_v22 = vld [vmem:[%s5684_s5 + $0x74] ss:$28 sps:$4 sm:$0xff]   ;;  %v4294_v24 = vld [vmem:[%s5684_s5 + $0x3c] ss:$28 sps:$4 sm:$0xff]  }
  0x1c   :  { %3793 = vmatpush3.bf16.msra.mxu0 %v4211_v26  ;;  %v4286_v23 = vld [vmem:[%s5684_s5 + $0x70] ss:$28 sps:$4 sm:$0xff]   ;;  %v4292_v25 = vld [vmem:[%s5684_s5 + $0x38] ss:$28 sps:$4 sm:$0xff]  }
  0x1d   :  { %3815 = vmatpush3.bf16.msra.mxu1 %v4212_v27  ;;  %3794 = vmatprep.subr.bf16.mxu0 %v4213_v28 }
  0x1e   :  { %3816 = vmatprep.subr.bf16.mxu1 %v4214_v29 }
  0x20   :  { %3795 = vmatpush3.bf16.msra.mxu0 %v4215_v30 }
  0x21   :  { %3817 = vmatpush3.bf16.msra.mxu1 %v4216_v31  ;;  %3824 = vmatprep.subr.bf16.mxu0 %v4221_v38 }
  0x22   :  { %4041 = vmatprep.subr.bf16.mxu1 %v4558_v39 }
  0x23   :  { %551 = vmatmul.mubr.bf16.vlgmr.msra.gmra.mxu0 %v3278_v34 }
  0x24   :  { %591 = vmatmul.mubr.bf16.vlgmr.msra.gmra.mxu1 %v3280_v36  ;;  %3825 = vmatpush3.bf16.msra.mxu0 %v4222_v40 }
  0x25   :  { %4042 = vmatpush3.bf16.msra.mxu1 %v4223_v41  ;;  %3826 = vmatprep.subr.bf16.mxu0 %v4224_v42 }
  0x26   :  { %4043 = vmatprep.subr.bf16.mxu1 %v4558_v39  ;;  %4057 = vmatprep.mubr.msk.bf16.mxu1 %vm4559_vm0, %v4558_v39 }
  0x27   :  { %630 = vmatprep.mubr.bf16.mxu0 %v3283_v62 }
  0x28   :  { %3827 = vmatpush3.bf16.msra.mxu0 %v4225_v43 }
  0x29   :  { %4044 = vmatpush3.bf16.msra.mxu1 %v4226_v44  ;;  %3828 = vmatprep.subr.bf16.mxu0 %v4227_v45 }
  0x2a   :  { %4045 = vmatprep.subr.bf16.mxu1 %v4558_v39 }
  0x2c   :  { %3829 = vmatpush3.bf16.msra.mxu0 %v4228_v46 }
  0x2d   :  { %4046 = vmatpush3.bf16.msra.mxu1 %v4229_v47  ;;  %3830 = vmatprep.subr.bf16.mxu0 %v4230_v48 }
  0x2e   :  { %4047 = vmatprep.subr.bf16.mxu1 %v4558_v39 }
  0x30   :  { %3831 = vmatpush3.bf16.msra.mxu0 %v4231_v49 }
  0x31   :  { %4048 = vmatpush3.bf16.msra.mxu1 %v4232_v50  ;;  %3832 = vmatprep.subr.bf16.mxu0 %v4233_v51 }
  0x32   :  { %4049 = vmatprep.subr.bf16.mxu1 %v4558_v39 }
  0x34   :  { %3833 = vmatpush3.bf16.msra.mxu0 %v4234_v52 }
  0x35   :  { %4050 = vmatpush3.bf16.msra.mxu1 %v4235_v53  ;;  %3834 = vmatprep.subr.bf16.mxu0 %v4236_v54 }
  0x36   :  { %4051 = vmatprep.subr.bf16.mxu1 %v4558_v39 }
  0x38   :  { %3835 = vmatpush3.bf16.msra.mxu0 %v4237_v55 }
  0x39   :  { %4052 = vmatpush3.bf16.msra.mxu1 %v4238_v56  ;;  %3836 = vmatprep.subr.bf16.mxu0 %v4239_v57 }
  0x3a   :  { %4053 = vmatprep.subr.bf16.mxu1 %v4558_v39 }
  0x3c   :  { %3837 = vmatpush3.bf16.msra.mxu0 %v4240_v58 }
  0x3d   :  { %4054 = vmatpush3.bf16.msra.mxu1 %v4241_v59  ;;  %3838 = vmatprep.subr.bf16.mxu0 %v4242_v61 }
  0x3e   :  { %4055 = vmatprep.subr.bf16.mxu1 %v4558_v39 }
  0x40   :  { %3839 = vmatpush3.bf16.msra.mxu0 %v4243_v63 }
  0x41   :  { %4056 = vmatpush3.bf16.msra.mxu1 %v4244_v0  ;;  %4061 = vmatprep.subr.bf16.mxu0 %v4558_v39 }
  0x42   :  { %1182 = vmatprep.subr.bf16.mxu1 %v4258_v12 }
  0x43   :  { %631 = vmatmul.mubr.bf16.vlgmr.msra.gmra.mxu0 %v3282_v2 }
  0x44   :  { %4058 = vmatmul.mubr.bf16.vlgmr.msra.gmra.mxu1 %v4247_v1  ;;  %4077 = vmatprep.mubr.msk.bf16.mxu0 %vm4559_vm0, %v4558_v39 }
  0x45   :  { %4062 = vmatpush3.bf16.msra.mxu0 %v4248_v3  ;;  %1183 = vmatpush1.bf16.msra.mxu1 %v4256_v11 }
  0x46   :  { %4063 = vmatprep.subr.bf16.mxu0 %v4558_v39  ;;  %1184 = vmatprep.subr.bf16.mxu1 %v4264_v14 }
  0x49   :  { %4064 = vmatpush3.bf16.msra.mxu0 %v4249_v4  ;;  %1185 = vmatpush1.bf16.msra.mxu1 %v4262_v15 }
  0x4a   :  { %4065 = vmatprep.subr.bf16.mxu0 %v4558_v39  ;;  %1186 = vmatprep.subr.bf16.mxu1 %v4270_v16 }
  0x4d   :  { %4066 = vmatpush3.bf16.msra.mxu0 %v4250_v5  ;;  %1187 = vmatpush1.bf16.msra.mxu1 %v4268_v17 }
  0x4e   :  { %4067 = vmatprep.subr.bf16.mxu0 %v4558_v39  ;;  %1188 = vmatprep.subr.bf16.mxu1 %v4276_v18 }
  0x51   :  { %4068 = vmatpush3.bf16.msra.mxu0 %v4251_v6  ;;  %1189 = vmatpush1.bf16.msra.mxu1 %v4274_v19 }
  0x52   :  { %4069 = vmatprep.subr.bf16.mxu0 %v4558_v39  ;;  %1190 = vmatprep.subr.bf16.mxu1 %v4282_v20 }
  0x55   :  { %4070 = vmatpush3.bf16.msra.mxu0 %v4252_v7  ;;  %1191 = vmatpush1.bf16.msra.mxu1 %v4280_v21 }
  0x56   :  { %4071 = vmatprep.subr.bf16.mxu0 %v4558_v39  ;;  %1192 = vmatprep.subr.bf16.mxu1 %v4288_v22 }
  0x59   :  { %4072 = vmatpush3.bf16.msra.mxu0 %v4253_v8  ;;  %1193 = vmatpush1.bf16.msra.mxu1 %v4286_v23 }
  0x5a   :  { %4073 = vmatprep.subr.bf16.mxu0 %v4558_v39  ;;  %1194 = vmatprep.subr.bf16.mxu1 %v4294_v24 }
  0x5d   :  { %4074 = vmatpush3.bf16.msra.mxu0 %v4254_v9  ;;  %1195 = vmatpush1.bf16.msra.mxu1 %v4292_v25 }
  0x5e   :  { %4075 = vmatprep.subr.bf16.mxu0 %v4558_v39 }
  0x61   :  { %4076 = vmatpush3.bf16.msra.mxu0 %v4255_v10 }
  0x62   :  { %1223 = vmatprep.subr.bf16.mxu0 %v4261_v13 }
  0x63   :  { %14 = vsyncpa [#allocation3], 0  ;;  %v3277_v35 = vld [vmem:[%s5681_s2] ss:$0 sm:$0xff]  ;;  %v4259_v52 = vld [vmem:[%s5684_s5 + $0x190] ss:$28 sps:$4 sm:$0xff]  }
  0x64   :  { %v4267_v54 = vld [vmem:[%s5684_s5 + $0x15c] ss:$28 sps:$4 sm:$0xff]   ;;  %v4273_v56 = vld [vmem:[%s5684_s5 + $0x124] ss:$28 sps:$4 sm:$0xff]   ;;  %v4279_v58 = vld [vmem:[%s5684_s5 + $0xec] ss:$28 sps:$4 sm:$0xff]  }
  0x65   :  { %v4265_v55 = vld [vmem:[%s5684_s5 + $0x158] ss:$28 sps:$4 sm:$0xff]   ;;  %v4271_v57 = vld [vmem:[%s5684_s5 + $0x120] ss:$28 sps:$4 sm:$0xff]   ;;  %v4277_v59 = vld [vmem:[%s5684_s5 + $0xe8] ss:$28 sps:$4 sm:$0xff]  }
  0x66   :  { %v4285_v60 = vld [vmem:[%s5684_s5 + $0xb4] ss:$28 sps:$4 sm:$0xff]   ;;  %v4291_v62 = vld [vmem:[%s5684_s5 + $0x7c] ss:$28 sps:$4 sm:$0xff]   ;;  %v4297_v0 = vld [vmem:[%s5684_s5 + $0x44] ss:$28 sps:$4 sm:$0xff]  }
  0x67   :  { %v4283_v61 = vld [vmem:[%s5684_s5 + $0xb0] ss:$28 sps:$4 sm:$0xff]   ;;  %v4289_v63 = vld [vmem:[%s5684_s5 + $0x78] ss:$28 sps:$4 sm:$0xff]   ;;  %v4295_v1 = vld [vmem:[%s5684_s5 + $0x40] ss:$28 sps:$4 sm:$0xff]  }
  0x68   :  { %v4300_v2 = vld [vmem:[%s5684_s5 + $0x4] ss:$28 sps:$4 sm:$0xff]   ;;  %v4303_v3 = vld [vmem:[%s5684_s5 + $0xc] ss:$28 sps:$4 sm:$0xff]   ;;  %v4306_v6 = vld [vmem:[%s5684_s5 + $0x19c] ss:$28 sps:$4 sm:$0xff]  }
  0x69   :  { %v4298_v4 = vld [vmem:[%s5684_s5] ss:$28 sps:$4 sm:$0xff]   ;;  %v4301_v5 = vld [vmem:[%s5684_s5 + $0x8] ss:$28 sps:$4 sm:$0xff]   ;;  %1196 = vmatprep.subr.bf16.mxu1 %v4300_v2  ;;  %v4560_v7 = vmov 0   ;;  %s4561_s16 = smov [#allocation2]  }
  0x6a   :  { %1197 = vmatpush1.bf16.msra.mxu1 %v4298_v4  ;;  %1214 = vmatprep.mubr.bf16.mxu1 %v4560_v7  ;;  %v3341_v8 = vld [vmem:[%s5683_s4] ss:$0 sm:$0xff]  ;;  %v4304_v14 = vld [vmem:[%s5684_s5 + $0x198] ss:$28 sps:$4 sm:$0xff]   ;;  %v4311_v20 = vld [vmem:[%s5684_s5 + $0x168] ss:$28 sps:$4 sm:$0xff]  }
  0x6b   :  { %1264 = vmatprep.subr.bf16.mxu1 %v4306_v6  ;;  %v4307_v15 = vld [vmem:[%s5684_s5 + $0x1a0] ss:$28 sps:$4 sm:$0xff]   ;;  %v4314_v21 = vld [vmem:[%s5684_s5 + $0x12c] ss:$28 sps:$4 sm:$0xff]   ;;  %v4318_v24 = vld [vmem:[%s5684_s5 + $0xf4] ss:$28 sps:$4 sm:$0xff]  }
  0x6c   :  { %v4310_v17 = vld [vmem:[%s5684_s5 + $0x164] ss:$28 sps:$4 sm:$0xff]   ;;  %v4315_v23 = vld [vmem:[%s5684_s5 + $0x130] ss:$28 sps:$4 sm:$0xff]   ;;  %s3269_s17 = sshll.u32 %s4561_s16, 4  ;;  %s3270_s17 = int_to_ptr.vmem [resolvable:$true] %s3269_s17 }
  0x6d   :  { %v4308_v19 = vld [vmem:[%s5684_s5 + $0x160] ss:$28 sps:$4 sm:$0xff]   ;;  %v4312_v22 = vld [vmem:[%s5684_s5 + $0x128] ss:$28 sps:$4 sm:$0xff]   ;;  %v4316_v25 = vld [vmem:[%s5684_s5 + $0xf0] ss:$28 sps:$4 sm:$0xff]   ;;  %p4541_p1 = scmp.lt.s32.totalorder %s3270_s17, %s3270_s17 }
  0x6e   :  { %v4362_v2 = vld [vmem:[%s5680_s1 + $0x1c8] sm:$0xff]   ;;  %v4364_v4 = vld [vmem:[%s5680_s1 + $0x200] sm:$0xff]   ;;  %s4536_s18 = scalar_lea.vmem %s3270_s17, 128 }
  0x6f   :  { %v4366_v6 = vld [vmem:[%s5680_s1 + $0x1c0] sm:$0xff]   ;;  %p4537_p0 = scmp.ne.s32.totalorder %s3270_s17, %s4536_s18  ;;  %p4542_p2 = scmp.lt.s32.totalorder %s4536_s18, %s4536_s18 }
  0x71   :  { %p4543_p3 = por %p4542_p2, %p4541_p1 }
  0x73   :  { %p4544_p4 = pnand %p4543_p3, %p4537_p0 }
  0xe3   :  { %v3796_v26 = vpop.f32.mrf.mxu0 }
  0xe4   :  { %v3818_v27 = vpop.f32.mrf.mxu1 }
  0xe5   :  { %v3797_v28 = vpop.f32.mrf.mxu0 }
  0xe6   :  { %v3819_v29 = vpop.f32.mrf.mxu1  ;;  %v3798_v34 = vadd.f32 %v3797_v28, %v3796_v26  ;;  %v4319_v26 = vld [vmem:[%s5684_s5 + $0xf8] ss:$28 sps:$4 sm:$0xff]  }
  0xe7   :  { %v3799_v30 = vpop.f32.mrf.mxu0  ;;  %v3820_v37 = vadd.f32 %v3819_v29, %v3818_v27  ;;  %v4322_v27 = vld [vmem:[%s5684_s5 + $0xbc] ss:$28 sps:$4 sm:$0xff]  }
  0xe8   :  { %v3821_v31 = vpop.f32.mrf.mxu1  ;;  %v553_v36 = vadd.f32 %v3798_v34, %v3277_v35  ;;  %v4320_v28 = vld [vmem:[%s5684_s5 + $0xb8] ss:$28 sps:$4 sm:$0xff]   ;;  %v4323_v29 = vld [vmem:[%s5684_s5 + $0xc0] ss:$28 sps:$4 sm:$0xff]   ;;  %v4328_v34 = vld [vmem:[%s5684_s5 + $0x48] ss:$28 sps:$4 sm:$0xff]  }
  0xe9   :  { %v3800_v32 = vpop.f32.mrf.mxu0  ;;  %v4326_v30 = vld [vmem:[%s5684_s5 + $0x84] ss:$28 sps:$4 sm:$0xff]   ;;  %v4331_v35 = vld [vmem:[%s5684_s5 + $0x50] ss:$28 sps:$4 sm:$0xff]  }
  0xea   :  { %v3822_v33 = vpop.f32.mrf.mxu1  ;;  %v593_v42 = vadd.f32 %v3820_v37, %v553_v36  ;;  %v4324_v31 = vld [vmem:[%s5684_s5 + $0x80] ss:$28 sps:$4 sm:$0xff]   ;;  %v4327_v32 = vld [vmem:[%s5684_s5 + $0x88] ss:$28 sps:$4 sm:$0xff]   ;;  %v4334_v36 = vld [vmem:[%s5684_s5 + $0x14] ss:$28 sps:$4 sm:$0xff]  }
  0xeb   :  { %v4330_v33 = vld [vmem:[%s5684_s5 + $0x4c] ss:$28 sps:$4 sm:$0xff]  }
  0xec   :  { %v4332_v37 = vld [vmem:[%s5684_s5 + $0x10] ss:$28 sps:$4 sm:$0xff]  }
 0x103   :  { %v3840_v38 = vpop.f32.mrf.mxu0 }
 0x104   :  { %v672_v40 = vpop.f32.mrf.mxu1 }
 0x105   :  { %v3841_v41 = vpop.f32.mrf.mxu0 }
 0x106   :  { %v3842_v43 = vadd.f32 %v3841_v41, %v3840_v38  ;;  %v4059_v44 = vpop.f32.mrf.mxu1  ;;  %v4335_v38 = vld [vmem:[%s5684_s5 + $0x18] ss:$28 sps:$4 sm:$0xff]  }
 0x107   :  { %v3843_v45 = vpop.f32.mrf.mxu0  ;;  %v4337_v41 = vld [vmem:[%s5680_s1 + $0x2b8] sm:$0xff]   ;;  %v4340_v44 = vld [vmem:[%s5680_s1 + $0x230] sm:$0xff]  }
 0x108   :  { %v633_v46 = vadd.f32 %v3842_v43, %v593_v42  ;;  %v675_v47 = vpop.f32.mrf.mxu1  ;;  %v4338_v42 = vld [vmem:[%s5680_s1 + $0x1f8] sm:$0xff]   ;;  %v4341_v45 = vld [vmem:[%s5680_s1 + $0x2b0] sm:$0xff]  }
 0x109   :  { %v3844_v48 = vpop.f32.mrf.mxu0  ;;  %v4339_v43 = vld [vmem:[%s5680_s1 + $0x278] sm:$0xff]   ;;  %v4343_v47 = vld [vmem:[%s5680_s1 + $0x270] sm:$0xff]  }
 0x10a   :  { %v673_v49 = vadd.f32 %v672_v40, %v633_v46  ;;  %v4060_v50 = vpop.f32.mrf.mxu1  ;;  %v4336_v40 = vld [vmem:[%s5680_s1 + $0x238] sm:$0xff]   ;;  %v4342_v46 = vld [vmem:[%s5680_s1 + $0x1f0] sm:$0xff]   ;;  %v4344_v48 = vld [vmem:[%s5680_s1 + $0x228] sm:$0xff]  }
 0x10b   :  { %v4346_v50 = vld [vmem:[%s5680_s1 + $0x1e8] sm:$0xff]  }
 0x10c   :  { %v678_v51 = vmax.f32 %v673_v49, 0.0  ;;  %v4345_v49 = vld [vmem:[%s5680_s1 + $0x2a8] sm:$0xff]  }
 0x10e   :  { %v679_v53 = vpack.c.bf16 %v678_v51, %v678_v51  ;;  %v4347_v51 = vld [vmem:[%s5680_s1 + $0x268] sm:$0xff]  }
 0x110   :  { %4078 = vmatmul.mubr.bf16.vlgmr.msra.gmra.mxu0 %v679_v53  ;;  %v4349_v53 = vld [vmem:[%s5680_s1 + $0x2a0] sm:$0xff]  }
 0x111   :  { %1224 = vmatpush1.bf16.msra.mxu0 %v4259_v52  ;;  %1255 = vmatprep.mubr.bf16.mxu0 %v4560_v7  ;;  %v4348_v52 = vld [vmem:[%s5680_s1 + $0x220] sm:$0xff]  }
 0x112   :  { %1225 = vmatprep.subr.bf16.mxu0 %v4267_v54  ;;  %v4350_v54 = vld [vmem:[%s5680_s1 + $0x1e0] sm:$0xff]  }
 0x115   :  { %1226 = vmatpush1.bf16.msra.mxu0 %v4265_v55  ;;  %v4351_v55 = vld [vmem:[%s5680_s1 + $0x260] sm:$0xff]  }
 0x116   :  { %1227 = vmatprep.subr.bf16.mxu0 %v4273_v56  ;;  %v4352_v56 = vld [vmem:[%s5680_s1 + $0x218] sm:$0xff]  }
 0x119   :  { %1228 = vmatpush1.bf16.msra.mxu0 %v4271_v57  ;;  %v4353_v57 = vld [vmem:[%s5680_s1 + $0x298] sm:$0xff]  }
 0x11a   :  { %1229 = vmatprep.subr.bf16.mxu0 %v4279_v58  ;;  %v4354_v58 = vld [vmem:[%s5680_s1 + $0x1d8] sm:$0xff]  }
 0x11d   :  { %1230 = vmatpush1.bf16.msra.mxu0 %v4277_v59  ;;  %v4355_v59 = vld [vmem:[%s5680_s1 + $0x258] sm:$0xff]  }
 0x11e   :  { %1231 = vmatprep.subr.bf16.mxu0 %v4285_v60  ;;  %v4356_v60 = vld [vmem:[%s5680_s1 + $0x210] sm:$0xff]  }
 0x121   :  { %1232 = vmatpush1.bf16.msra.mxu0 %v4283_v61  ;;  %v4357_v61 = vld [vmem:[%s5680_s1 + $0x290] sm:$0xff]  }
 0x122   :  { %1233 = vmatprep.subr.bf16.mxu0 %v4291_v62  ;;  %v4358_v62 = vld [vmem:[%s5680_s1 + $0x1d0] sm:$0xff]  }
 0x125   :  { %1234 = vmatpush1.bf16.msra.mxu0 %v4289_v63  ;;  %v4359_v63 = vld [vmem:[%s5680_s1 + $0x250] sm:$0xff]  }
 0x126   :  { %1235 = vmatprep.subr.bf16.mxu0 %v4297_v0  ;;  %v4360_v0 = vld [vmem:[%s5680_s1 + $0x208] sm:$0xff]  }
 0x129   :  { %1236 = vmatpush1.bf16.msra.mxu0 %v4295_v1  ;;  %v4361_v1 = vld [vmem:[%s5680_s1 + $0x288] sm:$0xff]  }
 0x12a   :  { %1237 = vmatprep.subr.bf16.mxu0 %v4303_v3  ;;  %v4363_v3 = vld [vmem:[%s5680_s1 + $0x248] sm:$0xff]  }
 0x12d   :  { %1238 = vmatpush1.bf16.msra.mxu0 %v4301_v5  ;;  %v4365_v5 = vld [vmem:[%s5680_s1 + $0x280] sm:$0xff]  }
 0x12e   :  { %4081 = vmatprep.subr.bf16.mxu0 %v4558_v39 }
 0x1d0   :  { %v785_v9 = vpop.f32.mrf.mxu0 }
 0x1d1   :  { %v786_v10 = vadd.f32 %v3341_v8, %v785_v9  ;;  %v4367_v8 = vld [vmem:[%s5680_s1 + $0x240] sm:$0xff]   ;;  %v4368_v9 = vld [vmem:[%s5680_s1 + $0x338] sm:$0xff]  }
 0x1d2   :  { %v4079_v11 = vpop.f32.mrf.mxu0 }
 0x1d3   :  { %v791_v12 = vmax.f32 %v786_v10, 0.0  ;;  %v859_v10 = vlaneseq }
 0x1d4   :  { %v788_v13 = vpop.f32.mrf.mxu0 }
 0x1d5   :  { %v4950_v16 = vpack.c.bf16 %v791_v12, %v791_v12  ;;  %v5129_v11 = vshrl.u32 %v859_v10, 7 }
 0x1d6   :  { %v4080_v18 = vpop.f32.mrf.mxu0 }
 0x1d7   :  { %1215 = vmatmul.mubr.bf16.vlgmr.msra.gmra.mxu1 %v4950_v16  ;;  %1256 = vmatmul.mubr.bf16.vlgmr.msra.gmra.mxu0 %v4950_v16  ;;  %v861_v12 = vsub.s32 0, %v5129_v11  ;;  %v869_v13 = vsub.s32 2, %v5129_v11 }
 0x1d8   :  { %1265 = vmatpush1.bf16.msra.mxu1 %v4304_v14  ;;  %4082 = vmatpush3.bf16.msra.mxu0 %v4307_v15  ;;  %v5136_v14 = vld [vmem:[%s5685_s6] sm:$0xff]  ;;  %v865_v15 = vsub.s32 1, %v5129_v11 }
 0x1d9   :  { %1266 = vmatprep.subr.bf16.mxu1 %v4310_v17  ;;  %4083 = vmatprep.subr.bf16.mxu0 %v4558_v39  ;;  %v862_v17 = vrot.slane %v5136_v14, %v861_v12  ;;  %v870_v18 = vrot.slane %v5136_v14, %v869_v13 }
 0x1da   :  { %1296 = vmatprep.mubr.bf16.mxu1 %v4560_v7  ;;  %4097 = vmatprep.mubr.msk.bf16.mxu0 %vm4559_vm0, %v4558_v39 }
 0x1dc   :  { %1267 = vmatpush1.bf16.msra.mxu1 %v4308_v19  ;;  %4084 = vmatpush3.bf16.msra.mxu0 %v4311_v20  ;;  %v866_v19 = vrot.slane %v5136_v14, %v865_v15 }
 0x1dd   :  { %1268 = vmatprep.subr.bf16.mxu1 %v4314_v21  ;;  %4085 = vmatprep.subr.bf16.mxu0 %v4558_v39 }
 0x1e0   :  { %1269 = vmatpush1.bf16.msra.mxu1 %v4312_v22  ;;  %4086 = vmatpush3.bf16.msra.mxu0 %v4315_v23 }
 0x1e1   :  { %1270 = vmatprep.subr.bf16.mxu1 %v4318_v24  ;;  %4087 = vmatprep.subr.bf16.mxu0 %v4558_v39 }
 0x1e4   :  { %1271 = vmatpush1.bf16.msra.mxu1 %v4316_v25  ;;  %4088 = vmatpush3.bf16.msra.mxu0 %v4319_v26 }
 0x1e5   :  { %1272 = vmatprep.subr.bf16.mxu1 %v4322_v27  ;;  %4089 = vmatprep.subr.bf16.mxu0 %v4558_v39 }
 0x1e8   :  { %1273 = vmatpush1.bf16.msra.mxu1 %v4320_v28  ;;  %4090 = vmatpush3.bf16.msra.mxu0 %v4323_v29 }
 0x1e9   :  { %1274 = vmatprep.subr.bf16.mxu1 %v4326_v30  ;;  %4091 = vmatprep.subr.bf16.mxu0 %v4558_v39 }
 0x1ec   :  { %1275 = vmatpush1.bf16.msra.mxu1 %v4324_v31  ;;  %4092 = vmatpush3.bf16.msra.mxu0 %v4327_v32 }
 0x1ed   :  { %1276 = vmatprep.subr.bf16.mxu1 %v4330_v33  ;;  %4093 = vmatprep.subr.bf16.mxu0 %v4558_v39  ;;  %v4369_v33 = vld [vmem:[%s5680_s1 + $0x2f8] sm:$0xff]  }
 0x1f0   :  { %1277 = vmatpush1.bf16.msra.mxu1 %v4328_v34  ;;  %4094 = vmatpush3.bf16.msra.mxu0 %v4331_v35  ;;  %v4370_v34 = vld [vmem:[%s5680_s1 + $0x378] sm:$0xff]  }
 0x1f1   :  { %1278 = vmatprep.subr.bf16.mxu1 %v4334_v36  ;;  %4095 = vmatprep.subr.bf16.mxu0 %v4558_v39 }
 0x1f4   :  { %1279 = vmatpush1.bf16.msra.mxu1 %v4332_v37  ;;  %4096 = vmatpush3.bf16.msra.mxu0 %v4335_v38 }
 0x1f5   :  { %3873 = vmatprep.subr.bf16.mxu1 %v4336_v40  ;;  %3895 = vmatprep.subr.bf16.mxu0 %v4337_v41  ;;  %v4371_v40 = vld [vmem:[%s5680_s1 + $0x330] sm:$0xff]  }
 0x1f6   :  { %v4372_v41 = vld [vmem:[%s5680_s1 + $0x2f0] sm:$0xff]  }
 0x1f7   :  { %1297 = vmatmul.mubr.bf16.vlgmr.msra.gmra.mxu1 %v4950_v16  ;;  %4098 = vmatmul.mubr.bf16.vlgmr.msra.gmra.mxu0 %v4950_v16  ;;  %v873_v16 = vsub.s32 3, %v5129_v11 }
 0x1f8   :  { %3874 = vmatpush3.bf16.msra.mxu1 %v4338_v42  ;;  %3896 = vmatpush3.bf16.msra.mxu0 %v4339_v43  ;;  %v4373_v42 = vld [vmem:[%s5680_s1 + $0x370] sm:$0xff]   ;;  %v4374_v43 = vld [vmem:[%s5680_s1 + $0x328] sm:$0xff]  }
 0x1f9   :  { %3875 = vmatprep.subr.bf16.mxu1 %v4340_v44  ;;  %3897 = vmatprep.subr.bf16.mxu0 %v4341_v45  ;;  %v874_v20 = vrot.slane %v5136_v14, %v873_v16  ;;  %v4375_v44 = vld [vmem:[%s5680_s1 + $0x2e8] sm:$0xff]  }
 0x1fa   :  { %v4376_v45 = vld [vmem:[%s5680_s1 + $0x368] sm:$0xff]  }
 0x1fc   :  { %3876 = vmatpush3.bf16.msra.mxu1 %v4342_v46  ;;  %3898 = vmatpush3.bf16.msra.mxu0 %v4343_v47  ;;  %v4377_v46 = vld [vmem:[%s5680_s1 + $0x320] sm:$0xff]  }
 0x1fd   :  { %3877 = vmatprep.subr.bf16.mxu1 %v4344_v48  ;;  %3899 = vmatprep.subr.bf16.mxu0 %v4345_v49  ;;  %v4378_v47 = vld [vmem:[%s5680_s1 + $0x2e0] sm:$0xff]   ;;  %v4380_v49 = vld [vmem:[%s5680_s1 + $0x318] sm:$0xff]  }
 0x1fe   :  { %v4379_v48 = vld [vmem:[%s5680_s1 + $0x360] sm:$0xff]  }
 0x200   :  { %3878 = vmatpush3.bf16.msra.mxu1 %v4346_v50  ;;  %3900 = vmatpush3.bf16.msra.mxu0 %v4347_v51  ;;  %v4381_v50 = vld [vmem:[%s5680_s1 + $0x2d8] sm:$0xff]  }
 0x201   :  { %3879 = vmatprep.subr.bf16.mxu1 %v4348_v52  ;;  %3901 = vmatprep.subr.bf16.mxu0 %v4349_v53  ;;  %v4382_v51 = vld [vmem:[%s5680_s1 + $0x358] sm:$0xff]   ;;  %v4383_v52 = vld [vmem:[%s5680_s1 + $0x310] sm:$0xff]  }
 0x202   :  { %v4384_v53 = vld [vmem:[%s5680_s1 + $0x2d0] sm:$0xff]  }
 0x204   :  { %3880 = vmatpush3.bf16.msra.mxu1 %v4350_v54  ;;  %3902 = vmatpush3.bf16.msra.mxu0 %v4351_v55  ;;  %v4385_v54 = vld [vmem:[%s5680_s1 + $0x350] sm:$0xff]   ;;  %v877_v55 = vsub.s32 4, %v5129_v11 }
 0x205   :  { %3881 = vmatprep.subr.bf16.mxu1 %v4352_v56  ;;  %3903 = vmatprep.subr.bf16.mxu0 %v4353_v57  ;;  %v885_v56 = vsub.s32 6, %v5129_v11  ;;  %v4386_v57 = vld [vmem:[%s5680_s1 + $0x308] sm:$0xff]  }
 0x208   :  { %3882 = vmatpush3.bf16.msra.mxu1 %v4354_v58  ;;  %3904 = vmatpush3.bf16.msra.mxu0 %v4355_v59  ;;  %v881_v58 = vsub.s32 5, %v5129_v11  ;;  %v4387_v59 = vld [vmem:[%s5680_s1 + $0x2c8] sm:$0xff]  }
 0x209   :  { %3883 = vmatprep.subr.bf16.mxu1 %v4356_v60  ;;  %3905 = vmatprep.subr.bf16.mxu0 %v4357_v61  ;;  %v4388_v60 = vld [vmem:[%s5680_s1 + $0x348] sm:$0xff]   ;;  %v878_v61 = vrot.slane %v5136_v14, %v877_v55 }
 0x20c   :  { %3884 = vmatpush3.bf16.msra.mxu1 %v4358_v62  ;;  %3906 = vmatpush3.bf16.msra.mxu0 %v4359_v63  ;;  %v886_v62 = vrot.slane %v5136_v14, %v885_v56  ;;  %v4389_v63 = vld [vmem:[%s5680_s1 + $0x300] sm:$0xff]  }
 0x20d   :  { %3885 = vmatprep.subr.bf16.mxu1 %v4360_v0  ;;  %3907 = vmatprep.subr.bf16.mxu0 %v4361_v1  ;;  %v882_v0 = vrot.slane %v5136_v14, %v881_v58 }
 0x210   :  { %3886 = vmatpush3.bf16.msra.mxu1 %v4362_v2  ;;  %3908 = vmatpush3.bf16.msra.mxu0 %v4363_v3  ;;  %v4390_v3 = vld [vmem:[%s5680_s1 + $0x2c0] sm:$0xff]  }
 0x211   :  { %3887 = vmatprep.subr.bf16.mxu1 %v4364_v4  ;;  %3909 = vmatprep.subr.bf16.mxu0 %v4365_v5  ;;  %v4391_v4 = vld [vmem:[%s5680_s1 + $0x340] sm:$0xff]  }
 0x214   :  { %3888 = vmatpush3.bf16.msra.mxu1 %v4366_v6  ;;  %3910 = vmatpush3.bf16.msra.mxu0 %v4367_v8 }
 0x215   :  { %4101 = vmatprep.subr.bf16.mxu0 %v4558_v39  ;;  %3917 = vmatprep.subr.bf16.mxu1 %v4368_v9 }
 0x297   :  { %v1216_v21 = vpop.f32.mrf.mxu1  ;;  %v1257_v22 = vpop.f32.mrf.mxu0 }
 0x298   :  { %v1217_v23 = vadd.f32 %v1216_v21, %v862_v17  ;;  %v1258_v24 = vadd.f32 %v1257_v22, %v870_v18 }
 0x299   :  { %v1218_v25 = vpop.f32.mrf.mxu1  ;;  %v1259_v26 = vpop.f32.mrf.mxu0 }
 0x29a   :  { %v1219_v27 = vadd.f32 %v1218_v25, %v866_v19  ;;  %v1260_v28 = vadd.f32 %v1259_v26, %v874_v20  ;;  %v1345_v35 = vpack.c.bf16 %v1217_v23, %v1217_v23  ;;  %v1347_v36 = vpack.c.bf16 %v1258_v24, %v1258_v24  ;;  %v4392_v23 = vld [vmem:[%s5682_s3 + $0x78] sm:$0xff]   ;;  %v4393_v24 = vld [vmem:[%s5682_s3 + $0x70] sm:$0xff]   ;;  %v4394_v25 = vld [vmem:[%s5682_s3 + $0x68] sm:$0xff]  }
 0x29b   :  { %v1220_v29 = vpop.f32.mrf.mxu1  ;;  %v1261_v30 = vpop.f32.mrf.mxu0  ;;  %v4395_v26 = vld [vmem:[%s5682_s3 + $0x60] sm:$0xff]  }
 0x29c   :  { %v1346_v31 = vpack.c.bf16 %v1219_v27, %v1219_v27  ;;  %v1348_v32 = vpack.c.bf16 %v1260_v28, %v1260_v28  ;;  %v4396_v27 = vld [vmem:[%s5682_s3 + $0x58] sm:$0xff]   ;;  %v4397_v28 = vld [vmem:[%s5682_s3 + $0x50] sm:$0xff]   ;;  %v4398_v29 = vld [vmem:[%s5682_s3 + $0x48] sm:$0xff]  }
 0x29d   :  { %v1221_v37 = vpop.f32.mrf.mxu1  ;;  %v1262_v38 = vpop.f32.mrf.mxu0  ;;  %v4399_v30 = vld [vmem:[%s5682_s3 + $0x40] sm:$0xff]  }
 0x29e   :  { %1841 = vmatprep.mubr.bf16.mxu1 %v1346_v31  ;;  %1881 = vmatprep.mubr.bf16.mxu0 %v1348_v32  ;;  %v4400_v31 = vld [vmem:[%s5684_s5 + $0x348] ss:$28 sps:$4 sm:$0xff]   ;;  %v4412_v37 = vld [vmem:[%s5684_s5 + $0x2d8] ss:$28 sps:$4 sm:$0xff]  }
 0x29f   :  { %1842 = vmatmul.mubr.bf16.vlgmr.msra.gmra.mxu1 %v1345_v35  ;;  %1882 = vmatmul.mubr.bf16.vlgmr.msra.gmra.mxu0 %v1347_v36  ;;  %v4402_v32 = vld [vmem:[%s5684_s5 + $0x34c] ss:$28 sps:$4 sm:$0xff]   ;;  %v4414_v36 = vld [vmem:[%s5684_s5 + $0x2dc] ss:$28 sps:$4 sm:$0xff]   ;;  %v4420_v38 = vld [vmem:[%s5684_s5 + $0x2a4] ss:$28 sps:$4 sm:$0xff]  }
 0x2a0   :  { %3918 = vmatpush3.bf16.msra.mxu1 %v4369_v33  ;;  %4102 = vmatpush3.bf16.msra.mxu0 %v4370_v34  ;;  %v4405_v33 = vld [vmem:[%s5684_s5 + $0x354] ss:$28 sps:$4 sm:$0xff]  }
 0x2a1   :  { %3919 = vmatprep.subr.bf16.mxu1 %v4371_v40  ;;  %4103 = vmatprep.subr.bf16.mxu0 %v4558_v39  ;;  %v4408_v34 = vld [vmem:[%s5684_s5 + $0x314] ss:$28 sps:$4 sm:$0xff]   ;;  %v4418_v40 = vld [vmem:[%s5684_s5 + $0x2a0] ss:$28 sps:$4 sm:$0xff]  }
 0x2a2   :  { %4117 = vmatprep.mubr.msk.bf16.mxu0 %vm4559_vm0, %v4558_v39  ;;  %v4406_v35 = vld [vmem:[%s5684_s5 + $0x310] ss:$28 sps:$4 sm:$0xff]  }
 0x2a4   :  { %3920 = vmatpush3.bf16.msra.mxu1 %v4372_v41  ;;  %4104 = vmatpush3.bf16.msra.mxu0 %v4373_v42  ;;  %v4426_v41 = vld [vmem:[%s5684_s5 + $0x26c] ss:$28 sps:$4 sm:$0xff]  }
 0x2a5   :  { %3921 = vmatprep.subr.bf16.mxu1 %v4374_v43  ;;  %4105 = vmatprep.subr.bf16.mxu0 %v4558_v39  ;;  %v4424_v42 = vld [vmem:[%s5684_s5 + $0x268] ss:$28 sps:$4 sm:$0xff]   ;;  %v4432_v43 = vld [vmem:[%s5684_s5 + $0x234] ss:$28 sps:$4 sm:$0xff]  }
 0x2a8   :  { %3922 = vmatpush3.bf16.msra.mxu1 %v4375_v44  ;;  %4106 = vmatpush3.bf16.msra.mxu0 %v4376_v45  ;;  %v4430_v44 = vld [vmem:[%s5684_s5 + $0x230] ss:$28 sps:$4 sm:$0xff]   ;;  %v4438_v45 = vld [vmem:[%s5684_s5 + $0x1fc] ss:$28 sps:$4 sm:$0xff]  }
 0x2a9   :  { %3923 = vmatprep.subr.bf16.mxu1 %v4377_v46  ;;  %4107 = vmatprep.subr.bf16.mxu0 %v4558_v39  ;;  %v4436_v46 = vld [vmem:[%s5684_s5 + $0x1f8] ss:$28 sps:$4 sm:$0xff]  }
 0x2ac   :  { %3924 = vmatpush3.bf16.msra.mxu1 %v4378_v47  ;;  %4108 = vmatpush3.bf16.msra.mxu0 %v4379_v48 }
 0x2ad   :  { %3925 = vmatprep.subr.bf16.mxu1 %v4380_v49  ;;  %4109 = vmatprep.subr.bf16.mxu0 %v4558_v39 }
 0x2b0   :  { %3926 = vmatpush3.bf16.msra.mxu1 %v4381_v50  ;;  %4110 = vmatpush3.bf16.msra.mxu0 %v4382_v51 }
 0x2b1   :  { %3927 = vmatprep.subr.bf16.mxu1 %v4383_v52  ;;  %4111 = vmatprep.subr.bf16.mxu0 %v4558_v39 }
 0x2b4   :  { %3928 = vmatpush3.bf16.msra.mxu1 %v4384_v53  ;;  %4112 = vmatpush3.bf16.msra.mxu0 %v4385_v54 }
 0x2b5   :  { %3929 = vmatprep.subr.bf16.mxu1 %v4386_v57  ;;  %4113 = vmatprep.subr.bf16.mxu0 %v4558_v39 }
 0x2b7   :  { %v1298_v1 = vpop.f32.mrf.mxu1  ;;  %v1339_v2 = vpop.f32.mrf.mxu0 }
 0x2b8   :  { %3930 = vmatpush3.bf16.msra.mxu1 %v4387_v59  ;;  %4114 = vmatpush3.bf16.msra.mxu0 %v4388_v60  ;;  %v1299_v5 = vadd.f32 %v1298_v1, %v878_v61  ;;  %v1340_v6 = vadd.f32 %v1339_v2, %v886_v62  ;;  %v3519_v59 = vld [vmem:[%s5681_s2 + $0x1] ss:$0 sm:$0xff] }
 0x2b9   :  { %v1300_v8 = vpop.f32.mrf.mxu1  ;;  %v4099_v9 = vpop.f32.mrf.mxu0  ;;  %3931 = vmatprep.subr.bf16.mxu1 %v4389_v63  ;;  %4115 = vmatprep.subr.bf16.mxu0 %v4558_v39 }
 0x2ba   :  { %v1301_v10 = vadd.f32 %v1300_v8, %v882_v0  ;;  %v1349_v19 = vpack.c.bf16 %v1299_v5, %v1299_v5  ;;  %v1351_v20 = vpack.c.bf16 %v1340_v6, %v1340_v6 }
 0x2bb   :  { %v1302_v14 = vpop.f32.mrf.mxu1  ;;  %v1342_v17 = vpop.f32.mrf.mxu0 }
 0x2bc   :  { %v1350_v18 = vpack.c.bf16 %v1301_v10, %v1301_v10  ;;  %3932 = vmatpush3.bf16.msra.mxu1 %v4390_v3  ;;  %4116 = vmatpush3.bf16.msra.mxu0 %v4391_v4  ;;  %v4403_v17 = vld [vmem:[%s5684_s5 + $0x350] ss:$28 sps:$4 sm:$0xff]  }
 0x2bd   :  { %v1303_v21 = vpop.f32.mrf.mxu1  ;;  %v4100_v22 = vpop.f32.mrf.mxu0  ;;  %4121 = vmatprep.subr.bf16.mxu1 %v4558_v39  ;;  %2477 = vmatprep.subr.bf16.mxu0 %v4402_v32  ;;  %v4447_v32 = vld [vmem:[%s5684_s5 + $0x1cc] ss:$28 sps:$4 sm:$0xff]  }
 0x2be   :  { %1921 = vmatprep.mubr.bf16.mxu1 %v1350_v18  ;;  %v4417_v21 = vld [vmem:[%s5684_s5 + $0x2e4] ss:$28 sps:$4 sm:$0xff]  }
 0x2bf   :  { %1922 = vmatmul.mubr.bf16.vlgmr.msra.gmra.mxu1 %v1349_v19  ;;  %4118 = vmatmul.mubr.bf16.vlgmr.msra.gmra.mxu0 %v1351_v20  ;;  %v4411_v19 = vld [vmem:[%s5684_s5 + $0x31c] ss:$28 sps:$4 sm:$0xff]  }
 0x2c0   :  { %4137 = vmatprep.mubr.msk.bf16.mxu1 %vm4559_vm0, %v4558_v39  ;;  %2509 = vmatprep.mubr.bf16.mxu0 %v4560_v7  ;;  %v4409_v20 = vld [vmem:[%s5684_s5 + $0x318] ss:$28 sps:$4 sm:$0xff]   ;;  %v4415_v22 = vld [vmem:[%s5684_s5 + $0x2e0] ss:$28 sps:$4 sm:$0xff]  }
 0x2c1   :  { %4122 = vmatpush3.bf16.msra.mxu1 %v4392_v23  ;;  %2478 = vmatpush1.bf16.msra.mxu0 %v4400_v31  ;;  %v4423_v23 = vld [vmem:[%s5684_s5 + $0x2ac] ss:$28 sps:$4 sm:$0xff]   ;;  %v4444_v31 = vld [vmem:[%s5684_s5 + $0x1c4] ss:$28 sps:$4 sm:$0xff]  }
 0x2c2   :  { %4123 = vmatprep.subr.bf16.mxu1 %v4558_v39  ;;  %2479 = vmatprep.subr.bf16.mxu0 %v4408_v34  ;;  %v4445_v34 = vld [vmem:[%s5684_s5 + $0x1c8] ss:$28 sps:$4 sm:$0xff]  }
 0x2c5   :  { %4124 = vmatpush3.bf16.msra.mxu1 %v4393_v24  ;;  %2480 = vmatpush1.bf16.msra.mxu0 %v4406_v35  ;;  %v4421_v24 = vld [vmem:[%s5684_s5 + $0x2a8] ss:$28 sps:$4 sm:$0xff]   ;;  %v4450_v35 = vld [vmem:[%s5684_s5 + $0x35c] ss:$28 sps:$4 sm:$0xff]  }
 0x2c6   :  { %4125 = vmatprep.subr.bf16.mxu1 %v4558_v39  ;;  %2481 = vmatprep.subr.bf16.mxu0 %v4414_v36  ;;  %v3593_v36 = vld [vmem:[%s5683_s4 + $0x1] ss:$0 sm:$0xff] }
 0x2c9   :  { %4126 = vmatpush3.bf16.msra.mxu1 %v4394_v25  ;;  %2482 = vmatpush1.bf16.msra.mxu0 %v4412_v37  ;;  %v4429_v25 = vld [vmem:[%s5684_s5 + $0x274] ss:$28 sps:$4 sm:$0xff]  }
 0x2ca   :  { %4127 = vmatprep.subr.bf16.mxu1 %v4558_v39  ;;  %2483 = vmatprep.subr.bf16.mxu0 %v4420_v38 }
 0x2cd   :  { %4128 = vmatpush3.bf16.msra.mxu1 %v4395_v26  ;;  %2484 = vmatpush1.bf16.msra.mxu0 %v4418_v40  ;;  %v4427_v26 = vld [vmem:[%s5684_s5 + $0x270] ss:$28 sps:$4 sm:$0xff]  }
 0x2ce   :  { %4129 = vmatprep.subr.bf16.mxu1 %v4558_v39  ;;  %2485 = vmatprep.subr.bf16.mxu0 %v4426_v41 }
 0x2d1   :  { %4130 = vmatpush3.bf16.msra.mxu1 %v4396_v27  ;;  %2486 = vmatpush1.bf16.msra.mxu0 %v4424_v42  ;;  %v4435_v27 = vld [vmem:[%s5684_s5 + $0x23c] ss:$28 sps:$4 sm:$0xff]  }
 0x2d2   :  { %4131 = vmatprep.subr.bf16.mxu1 %v4558_v39  ;;  %2487 = vmatprep.subr.bf16.mxu0 %v4432_v43  ;;  %v4448_v43 = vld [vmem:[%s5684_s5 + $0x358] ss:$28 sps:$4 sm:$0xff]  }
 0x2d5   :  { %4132 = vmatpush3.bf16.msra.mxu1 %v4397_v28  ;;  %2488 = vmatpush1.bf16.msra.mxu0 %v4430_v44  ;;  %v4433_v28 = vld [vmem:[%s5684_s5 + $0x238] ss:$28 sps:$4 sm:$0xff]   ;;  %v4451_v44 = vld [vmem:[%s5684_s5 + $0x360] ss:$28 sps:$4 sm:$0xff]  }
 0x2d6   :  { %4133 = vmatprep.subr.bf16.mxu1 %v4558_v39  ;;  %2489 = vmatprep.subr.bf16.mxu0 %v4438_v45 }
 0x2d9   :  { %4134 = vmatpush3.bf16.msra.mxu1 %v4398_v29  ;;  %2490 = vmatpush1.bf16.msra.mxu0 %v4436_v46  ;;  %v4441_v29 = vld [vmem:[%s5684_s5 + $0x204] ss:$28 sps:$4 sm:$0xff]  }
 0x2da   :  { %4135 = vmatprep.subr.bf16.mxu1 %v4558_v39  ;;  %2491 = vmatprep.subr.bf16.mxu0 %v4444_v31  ;;  %v4454_v46 = vld [vmem:[%s5684_s5 + $0x324] ss:$28 sps:$4 sm:$0xff]   ;;  %v4499_v31 = vld [vmem:[%s5686_s7 + $0x98] sm:$0xff]  }
 0x2dd   :  { %4136 = vmatpush3.bf16.msra.mxu1 %v4399_v30  ;;  %v4439_v30 = vld [vmem:[%s5684_s5 + $0x200] ss:$28 sps:$4 sm:$0xff]  }
 0x2de   :  { %2518 = vmatprep.subr.bf16.mxu1 %v4405_v33  ;;  %v4442_v33 = vld [vmem:[%s5684_s5 + $0x1c0] ss:$28 sps:$4 sm:$0xff]  }
 0x2df   :  { %2492 = vmatpush1.bf16.msra.mxu0 %v4442_v33  ;;  %v4501_v33 = vld [vmem:[%s5686_s7 + $0xd0] sm:$0xff]  }
 0x2e0   :  { %2559 = vmatprep.subr.bf16.mxu0 %v4450_v35  ;;  %v4503_v35 = vld [vmem:[%s5686_s7 + $0x90] sm:$0xff]  }
 0x35f   :  { %v3889_v47 = vpop.f32.mrf.mxu1  ;;  %v3911_v48 = vpop.f32.mrf.mxu0 }
 0x361   :  { %v3890_v49 = vpop.f32.mrf.mxu1  ;;  %v3912_v50 = vpop.f32.mrf.mxu0 }
 0x362   :  { %v3891_v57 = vadd.f32 %v3890_v49, %v3889_v47  ;;  %v3913_v63 = vadd.f32 %v3912_v50, %v3911_v48  ;;  %v4452_v48 = vld [vmem:[%s5684_s5 + $0x320] ss:$28 sps:$4 sm:$0xff]   ;;  %v4455_v49 = vld [vmem:[%s5684_s5 + $0x328] ss:$28 sps:$4 sm:$0xff]  }
 0x363   :  { %v3892_v51 = vpop.f32.mrf.mxu1  ;;  %v3914_v52 = vpop.f32.mrf.mxu0  ;;  %v4458_v50 = vld [vmem:[%s5684_s5 + $0x2ec] ss:$28 sps:$4 sm:$0xff]  }
 0x364   :  { %v1844_v60 = vadd.f32 %v3891_v57, %v3519_v59  ;;  %v4456_v51 = vld [vmem:[%s5684_s5 + $0x2e8] ss:$28 sps:$4 sm:$0xff]   ;;  %v4459_v52 = vld [vmem:[%s5684_s5 + $0x2f0] ss:$28 sps:$4 sm:$0xff]   ;;  %v4466_v57 = vld [vmem:[%s5684_s5 + $0x27c] ss:$28 sps:$4 sm:$0xff]  }
 0x365   :  { %v3893_v53 = vpop.f32.mrf.mxu1  ;;  %v3915_v54 = vpop.f32.mrf.mxu0  ;;  %v4464_v59 = vld [vmem:[%s5684_s5 + $0x278] ss:$28 sps:$4 sm:$0xff]  }
 0x366   :  { %v1884_v2 = vadd.f32 %v3913_v63, %v1844_v60  ;;  %v4460_v53 = vld [vmem:[%s5684_s5 + $0x2b0] ss:$28 sps:$4 sm:$0xff]   ;;  %v4463_v54 = vld [vmem:[%s5684_s5 + $0x2b8] ss:$28 sps:$4 sm:$0xff]   ;;  %v4467_v60 = vld [vmem:[%s5684_s5 + $0x280] ss:$28 sps:$4 sm:$0xff]  }
 0x367   :  { %v4471_v63 = vld [vmem:[%s5684_s5 + $0x248] ss:$28 sps:$4 sm:$0xff]  }
 0x37f   :  { %v3933_v61 = vpop.f32.mrf.mxu1  ;;  %v1963_v62 = vpop.f32.mrf.mxu0 }
 0x381   :  { %v3934_v0 = vpop.f32.mrf.mxu1  ;;  %v4119_v1 = vpop.f32.mrf.mxu0 }
 0x382   :  { %v3935_v3 = vadd.f32 %v3934_v0, %v3933_v61  ;;  %v4470_v61 = vld [vmem:[%s5684_s5 + $0x244] ss:$28 sps:$4 sm:$0xff]   ;;  %v4474_v0 = vld [vmem:[%s5684_s5 + $0x20c] ss:$28 sps:$4 sm:$0xff]  }
 0x383   :  { %v3936_v4 = vpop.f32.mrf.mxu1  ;;  %v1966_v5 = vpop.f32.mrf.mxu0  ;;  %v4472_v1 = vld [vmem:[%s5684_s5 + $0x208] ss:$28 sps:$4 sm:$0xff]  }
 0x384   :  { %v1924_v6 = vadd.f32 %v3935_v3, %v1884_v2  ;;  %v4475_v2 = vld [vmem:[%s5684_s5 + $0x210] ss:$28 sps:$4 sm:$0xff]   ;;  %v4479_v5 = vld [vmem:[%s5684_s5 + $0x1d8] ss:$28 sps:$4 sm:$0xff]  }
 0x385   :  { %v3937_v8 = vpop.f32.mrf.mxu1  ;;  %v4120_v9 = vpop.f32.mrf.mxu0  ;;  %v4478_v3 = vld [vmem:[%s5684_s5 + $0x1d4] ss:$28 sps:$4 sm:$0xff]  }
 0x386   :  { %v1964_v10 = vadd.f32 %v1963_v62, %v1924_v6  ;;  %v4468_v62 = vld [vmem:[%s5684_s5 + $0x240] ss:$28 sps:$4 sm:$0xff]   ;;  %v4476_v4 = vld [vmem:[%s5684_s5 + $0x1d0] ss:$28 sps:$4 sm:$0xff]  }
 0x387   :  { %v4480_v6 = vld [vmem:[%s5686_s7 + $0x78] sm:$0xff]  }
 0x388   :  { %v1969_v14 = vmax.f32 %v1964_v10, 0.0  ;;  %v4481_v8 = vld [vmem:[%s5686_s7 + $0xf8] sm:$0xff]  }
 0x389   :  { %v4482_v9 = vld [vmem:[%s5686_s7 + $0x38] sm:$0xff]  }
 0x38a   :  { %v1970_v18 = vpack.c.bf16 %v1969_v14, %v1969_v14  ;;  %v4483_v10 = vld [vmem:[%s5686_s7 + $0xb8] sm:$0xff]   ;;  %v4484_v14 = vld [vmem:[%s5686_s7 + $0x70] sm:$0xff]  }
 0x38c   :  { %4138 = vmatmul.mubr.bf16.vlgmr.msra.gmra.mxu1 %v1970_v18  ;;  %v4486_v18 = vld [vmem:[%s5686_s7 + $0x30] sm:$0xff]  }
 0x38d   :  { %2519 = vmatpush1.bf16.msra.mxu1 %v4403_v17  ;;  %2550 = vmatprep.mubr.bf16.mxu1 %v4560_v7  ;;  %v4485_v17 = vld [vmem:[%s5686_s7 + $0xf0] sm:$0xff]  }
 0x38e   :  { %2520 = vmatprep.subr.bf16.mxu1 %v4411_v19  ;;  %v4487_v19 = vld [vmem:[%s5686_s7 + $0xb0] sm:$0xff]  }
 0x391   :  { %2521 = vmatpush1.bf16.msra.mxu1 %v4409_v20  ;;  %v4488_v20 = vld [vmem:[%s5686_s7 + $0x68] sm:$0xff]  }
 0x392   :  { %2522 = vmatprep.subr.bf16.mxu1 %v4417_v21  ;;  %v4489_v21 = vld [vmem:[%s5686_s7 + $0xe8] sm:$0xff]  }
 0x395   :  { %2523 = vmatpush1.bf16.msra.mxu1 %v4415_v22  ;;  %v4490_v22 = vld [vmem:[%s5686_s7 + $0x28] sm:$0xff]  }
 0x396   :  { %2524 = vmatprep.subr.bf16.mxu1 %v4423_v23  ;;  %v4491_v23 = vld [vmem:[%s5686_s7 + $0xa8] sm:$0xff]  }
 0x399   :  { %2525 = vmatpush1.bf16.msra.mxu1 %v4421_v24  ;;  %v4492_v24 = vld [vmem:[%s5686_s7 + $0x60] sm:$0xff]  }
 0x39a   :  { %2526 = vmatprep.subr.bf16.mxu1 %v4429_v25  ;;  %v4493_v25 = vld [vmem:[%s5686_s7 + $0xe0] sm:$0xff]  }
 0x39d   :  { %2527 = vmatpush1.bf16.msra.mxu1 %v4427_v26  ;;  %v4494_v26 = vld [vmem:[%s5686_s7 + $0x20] sm:$0xff]  }
 0x39e   :  { %2528 = vmatprep.subr.bf16.mxu1 %v4435_v27  ;;  %v4495_v27 = vld [vmem:[%s5686_s7 + $0xa0] sm:$0xff]  }
 0x3a1   :  { %2529 = vmatpush1.bf16.msra.mxu1 %v4433_v28  ;;  %v4496_v28 = vld [vmem:[%s5686_s7 + $0x58] sm:$0xff]  }
 0x3a2   :  { %2530 = vmatprep.subr.bf16.mxu1 %v4441_v29  ;;  %v4497_v29 = vld [vmem:[%s5686_s7 + $0xd8] sm:$0xff]  }
 0x3a5   :  { %2531 = vmatpush1.bf16.msra.mxu1 %v4439_v30  ;;  %v4498_v30 = vld [vmem:[%s5686_s7 + $0x18] sm:$0xff]  }
 0x3a6   :  { %2532 = vmatprep.subr.bf16.mxu1 %v4447_v32  ;;  %v4500_v32 = vld [vmem:[%s5686_s7 + $0x50] sm:$0xff]  }
 0x3a9   :  { %2533 = vmatpush1.bf16.msra.mxu1 %v4445_v34  ;;  %v4502_v34 = vld [vmem:[%s5686_s7 + $0x10] sm:$0xff]  }
 0x3aa   :  { %4141 = vmatprep.subr.bf16.mxu1 %v4558_v39 }
 0x44c   :  { %v2078_v37 = vpop.f32.mrf.mxu1 }
 0x44d   :  { %v2079_v38 = vadd.f32 %v3593_v36, %v2078_v37  ;;  %v4504_v36 = vld [vmem:[%s5686_s7 + $0x48] sm:$0xff]  }
 0x44e   :  { %v4139_v40 = vpop.f32.mrf.mxu1  ;;  %v4505_v37 = vld [vmem:[%s5686_s7 + $0xc8] sm:$0xff]  }
 0x44f   :  { %v2084_v41 = vmax.f32 %v2079_v38, 0.0  ;;  %v4506_v38 = vld [vmem:[%s5686_s7 + $0x8] sm:$0xff]  }
 0x450   :  { %v2081_v42 = vpop.f32.mrf.mxu1  ;;  %v4507_v40 = vld [vmem:[%s5686_s7 + $0x88] sm:$0xff]  }
 0x451   :  { %v5390_v45 = vpack.c.bf16 %v2084_v41, %v2084_v41  ;;  %v4508_v41 = vld [vmem:[%s5686_s7 + $0x40] sm:$0xff]  }
 0x452   :  { %v4140_v47 = vpop.f32.mrf.mxu1  ;;  %v4509_v42 = vld [vmem:[%s5686_s7 + $0xc0] sm:$0xff]  }
 0x453   :  { %2510 = vmatmul.mubr.bf16.vlgmr.msra.gmra.mxu0 %v5390_v45  ;;  %2551 = vmatmul.mubr.bf16.vlgmr.msra.gmra.mxu1 %v5390_v45 }
 0x454   :  { %2560 = vmatpush1.bf16.msra.mxu0 %v4448_v43  ;;  %4142 = vmatpush3.bf16.msra.mxu1 %v4451_v44  ;;  %v4510_v43 = vld [vmem:[%s5686_s7] sm:$0xff]  }
 0x455   :  { %2561 = vmatprep.subr.bf16.mxu0 %v4454_v46  ;;  %4143 = vmatprep.subr.bf16.mxu1 %v4558_v39  ;;  %v4511_v44 = vld [vmem:[%s5686_s7 + $0x80] sm:$0xff]  }
 0x456   :  { %2591 = vmatprep.mubr.bf16.mxu0 %v4560_v7  ;;  %4157 = vmatprep.mubr.msk.bf16.mxu1 %vm4559_vm0, %v4558_v39  ;;  %v4462_v7 = vld [vmem:[%s5684_s5 + $0x2b4] ss:$28 sps:$4 sm:$0xff]   ;;  %v5572_v46 = vld [vmem:[%s5685_s6 + $0x7] sm:$0xff] }
 0x457   :  { %v2157_v47 = vrot.slane %v5572_v46, %v861_v12 }
 0x458   :  { %2562 = vmatpush1.bf16.msra.mxu0 %v4452_v48  ;;  %4144 = vmatpush3.bf16.msra.mxu1 %v4455_v49  ;;  %v2165_v48 = vrot.slane %v5572_v46, %v869_v13  ;;  %v2161_v49 = vrot.slane %v5572_v46, %v865_v15  ;;  %v4513_v15 = vld [vmem:[%s5686_s7 + $0x138] sm:$0xff]  }
 0x459   :  { %2563 = vmatprep.subr.bf16.mxu0 %v4458_v50  ;;  %4145 = vmatprep.subr.bf16.mxu1 %v4558_v39  ;;  %v2169_v50 = vrot.slane %v5572_v46, %v873_v16  ;;  %v4514_v16 = vld [vmem:[%s5686_s7 + $0x1b8] sm:$0xff]  }
 0x45c   :  { %2564 = vmatpush1.bf16.msra.mxu0 %v4456_v51  ;;  %4146 = vmatpush3.bf16.msra.mxu1 %v4459_v52 }
 0x45d   :  { %2565 = vmatprep.subr.bf16.mxu0 %v4462_v7  ;;  %4147 = vmatprep.subr.bf16.mxu1 %v4558_v39 }
 0x460   :  { %2566 = vmatpush1.bf16.msra.mxu0 %v4460_v53  ;;  %4148 = vmatpush3.bf16.msra.mxu1 %v4463_v54 }
 0x461   :  { %2567 = vmatprep.subr.bf16.mxu0 %v4466_v57  ;;  %4149 = vmatprep.subr.bf16.mxu1 %v4558_v39 }
 0x464   :  { %2568 = vmatpush1.bf16.msra.mxu0 %v4464_v59  ;;  %4150 = vmatpush3.bf16.msra.mxu1 %v4467_v60 }
 0x465   :  { %2569 = vmatprep.subr.bf16.mxu0 %v4470_v61  ;;  %4151 = vmatprep.subr.bf16.mxu1 %v4558_v39 }
 0x468   :  { %2570 = vmatpush1.bf16.msra.mxu0 %v4468_v62  ;;  %4152 = vmatpush3.bf16.msra.mxu1 %v4471_v63 }
 0x469   :  { %2571 = vmatprep.subr.bf16.mxu0 %v4474_v0  ;;  %4153 = vmatprep.subr.bf16.mxu1 %v4558_v39 }
 0x46c   :  { %2572 = vmatpush1.bf16.msra.mxu0 %v4472_v1  ;;  %4154 = vmatpush3.bf16.msra.mxu1 %v4475_v2 }
 0x46d   :  { %2573 = vmatprep.subr.bf16.mxu0 %v4478_v3  ;;  %4155 = vmatprep.subr.bf16.mxu1 %v4558_v39  ;;  %v4515_v3 = vld [vmem:[%s5686_s7 + $0x170] sm:$0xff]  }
 0x470   :  { %2574 = vmatpush1.bf16.msra.mxu0 %v4476_v4  ;;  %4156 = vmatpush3.bf16.msra.mxu1 %v4479_v5  ;;  %v4516_v4 = vld [vmem:[%s5686_s7 + $0x130] sm:$0xff]  }
 0x471   :  { %3966 = vmatprep.subr.bf16.mxu0 %v4480_v6  ;;  %3988 = vmatprep.subr.bf16.mxu1 %v4481_v8  ;;  %v4517_v5 = vld [vmem:[%s5686_s7 + $0x1b0] sm:$0xff]   ;;  %v4518_v6 = vld [vmem:[%s5686_s7 + $0x168] sm:$0xff]  }
 0x472   :  { %v4519_v8 = vld [vmem:[%s5686_s7 + $0x128] sm:$0xff]  }
 0x473   :  { %2592 = vmatmul.mubr.bf16.vlgmr.msra.gmra.mxu0 %v5390_v45  ;;  %4158 = vmatmul.mubr.bf16.vlgmr.msra.gmra.mxu1 %v5390_v45  ;;  %v4512_v45 = vld [vmem:[%s5686_s7 + $0x178] sm:$0xff]  }
 0x474   :  { %3967 = vmatpush3.bf16.msra.mxu0 %v4482_v9  ;;  %3989 = vmatpush3.bf16.msra.mxu1 %v4483_v10  ;;  %v4520_v9 = vld [vmem:[%s5686_s7 + $0x1a8] sm:$0xff]   ;;  %v4521_v10 = vld [vmem:[%s5686_s7 + $0x160] sm:$0xff]  }
 0x475   :  { %3968 = vmatprep.subr.bf16.mxu0 %v4484_v14  ;;  %3990 = vmatprep.subr.bf16.mxu1 %v4485_v17  ;;  %v4522_v14 = vld [vmem:[%s5686_s7 + $0x120] sm:$0xff]  }
 0x476   :  { %v4523_v17 = vld [vmem:[%s5686_s7 + $0x1a0] sm:$0xff]  }
 0x478   :  { %3969 = vmatpush3.bf16.msra.mxu0 %v4486_v18  ;;  %3991 = vmatpush3.bf16.msra.mxu1 %v4487_v19  ;;  %v4524_v18 = vld [vmem:[%s5686_s7 + $0x158] sm:$0xff]  }
 0x479   :  { %3970 = vmatprep.subr.bf16.mxu0 %v4488_v20  ;;  %3992 = vmatprep.subr.bf16.mxu1 %v4489_v21  ;;  %v4525_v19 = vld [vmem:[%s5686_s7 + $0x118] sm:$0xff]   ;;  %v4527_v21 = vld [vmem:[%s5686_s7 + $0x150] sm:$0xff]  }
 0x47a   :  { %v4526_v20 = vld [vmem:[%s5686_s7 + $0x198] sm:$0xff]  }
 0x47c   :  { %3971 = vmatpush3.bf16.msra.mxu0 %v4490_v22  ;;  %3993 = vmatpush3.bf16.msra.mxu1 %v4491_v23  ;;  %v4528_v22 = vld [vmem:[%s5686_s7 + $0x110] sm:$0xff]  }
 0x47d   :  { %3972 = vmatprep.subr.bf16.mxu0 %v4492_v24  ;;  %3994 = vmatprep.subr.bf16.mxu1 %v4493_v25  ;;  %v4529_v23 = vld [vmem:[%s5686_s7 + $0x190] sm:$0xff]   ;;  %v4530_v24 = vld [vmem:[%s5686_s7 + $0x148] sm:$0xff]  }
 0x47e   :  { %v4531_v25 = vld [vmem:[%s5686_s7 + $0x108] sm:$0xff]  }
 0x480   :  { %3973 = vmatpush3.bf16.msra.mxu0 %v4494_v26  ;;  %3995 = vmatpush3.bf16.msra.mxu1 %v4495_v27  ;;  %v4532_v26 = vld [vmem:[%s5686_s7 + $0x188] sm:$0xff]   ;;  %v2173_v27 = vrot.slane %v5572_v46, %v877_v55  ;;  %v4534_v55 = vld [vmem:[%s5686_s7 + $0x100] sm:$0xff]  }
 0x481   :  { %3974 = vmatprep.subr.bf16.mxu0 %v4496_v28  ;;  %3996 = vmatprep.subr.bf16.mxu1 %v4497_v29  ;;  %v2181_v28 = vrot.slane %v5572_v46, %v885_v56  ;;  %v4533_v29 = vld [vmem:[%s5686_s7 + $0x140] sm:$0xff]  }
 0x482   :  { %v4535_v56 = vld [vmem:[%s5686_s7 + $0x180] sm:$0xff]  }
 0x484   :  { %3975 = vmatpush3.bf16.msra.mxu0 %v4498_v30  ;;  %3997 = vmatpush3.bf16.msra.mxu1 %v4499_v31  ;;  %v2177_v30 = vrot.slane %v5572_v46, %v881_v58 }
 0x485   :  { %3976 = vmatprep.subr.bf16.mxu0 %v4500_v32  ;;  %3998 = vmatprep.subr.bf16.mxu1 %v4501_v33 }
 0x488   :  { %3977 = vmatpush3.bf16.msra.mxu0 %v4502_v34  ;;  %3999 = vmatpush3.bf16.msra.mxu1 %v4503_v35 }
 0x489   :  { %3978 = vmatprep.subr.bf16.mxu0 %v4504_v36  ;;  %4000 = vmatprep.subr.bf16.mxu1 %v4505_v37 }
 0x48c   :  { %3979 = vmatpush3.bf16.msra.mxu0 %v4506_v38  ;;  %4001 = vmatpush3.bf16.msra.mxu1 %v4507_v40 }
 0x48d   :  { %3980 = vmatprep.subr.bf16.mxu0 %v4508_v41  ;;  %4002 = vmatprep.subr.bf16.mxu1 %v4509_v42 }
 0x490   :  { %3981 = vmatpush3.bf16.msra.mxu0 %v4510_v43  ;;  %4003 = vmatpush3.bf16.msra.mxu1 %v4511_v44 }
 0x491   :  { %4161 = vmatprep.subr.bf16.mxu1 %v4558_v39  ;;  %4010 = vmatprep.subr.bf16.mxu0 %v4512_v45 }
 0x513   :  { %v2511_v51 = vpop.f32.mrf.mxu0  ;;  %v2552_v52 = vpop.f32.mrf.mxu1 }
 0x514   :  { %v2512_v7 = vadd.f32 %v2511_v51, %v2157_v47  ;;  %v2553_v53 = vadd.f32 %v2552_v52, %v2165_v48  ;;  %v3723_v52 = vld [vmem:[%s5687_s8] ss:$0 sm:$0xff] }
 0x515   :  { %v2513_v54 = vpop.f32.mrf.mxu0  ;;  %v2554_v57 = vpop.f32.mrf.mxu1 }
 0x516   :  { %v2514_v59 = vadd.f32 %v2513_v54, %v2161_v49  ;;  %v2555_v12 = vadd.f32 %v2554_v57, %v2169_v50  ;;  %v2640_v63 = vpack.c.bf16 %v2512_v7, %v2512_v7  ;;  %v2642_v0 = vpack.c.bf16 %v2553_v53, %v2553_v53 }
 0x517   :  { %v2515_v60 = vpop.f32.mrf.mxu0  ;;  %v2556_v61 = vpop.f32.mrf.mxu1 }
 0x518   :  { %v2641_v62 = vpack.c.bf16 %v2514_v59, %v2514_v59  ;;  %v2643_v13 = vpack.c.bf16 %v2555_v12, %v2555_v12 }
 0x519   :  { %v2516_v1 = vpop.f32.mrf.mxu0  ;;  %v2557_v2 = vpop.f32.mrf.mxu1 }
 0x51a   :  { %3134 = vmatprep.mubr.bf16.mxu0 %v2641_v62  ;;  %3174 = vmatprep.mubr.bf16.mxu1 %v2643_v13 }
 0x51b   :  { %3135 = vmatmul.mubr.bf16.vlgmr.msra.gmra.mxu0 %v2640_v63  ;;  %3175 = vmatmul.mubr.bf16.vlgmr.msra.gmra.mxu1 %v2642_v0 }
 0x51c   :  { %4011 = vmatpush3.bf16.msra.mxu0 %v4513_v15  ;;  %4162 = vmatpush3.bf16.msra.mxu1 %v4514_v16 }
 0x51d   :  { %4012 = vmatprep.subr.bf16.mxu0 %v4515_v3  ;;  %4163 = vmatprep.subr.bf16.mxu1 %v4558_v39 }
 0x51e   :  { %4177 = vmatprep.mubr.msk.bf16.mxu1 %vm4559_vm0, %v4558_v39 }
 0x520   :  { %4013 = vmatpush3.bf16.msra.mxu0 %v4516_v4  ;;  %4164 = vmatpush3.bf16.msra.mxu1 %v4517_v5 }
 0x521   :  { %4014 = vmatprep.subr.bf16.mxu0 %v4518_v6  ;;  %4165 = vmatprep.subr.bf16.mxu1 %v4558_v39 }
 0x524   :  { %4015 = vmatpush3.bf16.msra.mxu0 %v4519_v8  ;;  %4166 = vmatpush3.bf16.msra.mxu1 %v4520_v9 }
 0x525   :  { %4016 = vmatprep.subr.bf16.mxu0 %v4521_v10  ;;  %4167 = vmatprep.subr.bf16.mxu1 %v4558_v39 }
 0x528   :  { %4017 = vmatpush3.bf16.msra.mxu0 %v4522_v14  ;;  %4168 = vmatpush3.bf16.msra.mxu1 %v4523_v17 }
 0x529   :  { %4018 = vmatprep.subr.bf16.mxu0 %v4524_v18  ;;  %4169 = vmatprep.subr.bf16.mxu1 %v4558_v39 }
 0x52c   :  { %4019 = vmatpush3.bf16.msra.mxu0 %v4525_v19  ;;  %4170 = vmatpush3.bf16.msra.mxu1 %v4526_v20 }
 0x52d   :  { %4020 = vmatprep.subr.bf16.mxu0 %v4527_v21  ;;  %4171 = vmatprep.subr.bf16.mxu1 %v4558_v39 }
 0x530   :  { %4021 = vmatpush3.bf16.msra.mxu0 %v4528_v22  ;;  %4172 = vmatpush3.bf16.msra.mxu1 %v4529_v23 }
 0x531   :  { %4022 = vmatprep.subr.bf16.mxu0 %v4530_v24  ;;  %4173 = vmatprep.subr.bf16.mxu1 %v4558_v39 }
 0x533   :  { %v2593_v31 = vpop.f32.mrf.mxu0  ;;  %v2634_v32 = vpop.f32.mrf.mxu1 }
 0x534   :  { %4023 = vmatpush3.bf16.msra.mxu0 %v4531_v25  ;;  %4174 = vmatpush3.bf16.msra.mxu1 %v4532_v26  ;;  %v2594_v33 = vadd.f32 %v2593_v31, %v2173_v27  ;;  %v2635_v34 = vadd.f32 %v2634_v32, %v2181_v28 }
 0x535   :  { %v2595_v35 = vpop.f32.mrf.mxu0  ;;  %v4159_v36 = vpop.f32.mrf.mxu1  ;;  %4024 = vmatprep.subr.bf16.mxu0 %v4533_v29  ;;  %4175 = vmatprep.subr.bf16.mxu1 %v4558_v39 }
 0x536   :  { %v2596_v11 = vadd.f32 %v2595_v35, %v2177_v30  ;;  %v2644_v40 = vpack.c.bf16 %v2594_v33, %v2594_v33  ;;  %v2646_v41 = vpack.c.bf16 %v2635_v34, %v2635_v34 }
 0x537   :  { %v2597_v58 = vpop.f32.mrf.mxu0  ;;  %v2637_v37 = vpop.f32.mrf.mxu1 }
 0x538   :  { %v2645_v38 = vpack.c.bf16 %v2596_v11, %v2596_v11  ;;  %4025 = vmatpush3.bf16.msra.mxu0 %v4534_v55  ;;  %4176 = vmatpush3.bf16.msra.mxu1 %v4535_v56 }
 0x539   :  { %v2598_v42 = vpop.f32.mrf.mxu0  ;;  %v4160_v43 = vpop.f32.mrf.mxu1 }
 0x53a   :  { %3214 = vmatprep.mubr.bf16.mxu0 %v2645_v38 }
 0x53b   :  { %3215 = vmatmul.mubr.bf16.vlgmr.msra.gmra.mxu0 %v2644_v40  ;;  %4178 = vmatmul.mubr.bf16.vlgmr.msra.gmra.mxu1 %v2646_v41 }
 0x5db   :  { %v3982_v44 = vpop.f32.mrf.mxu0  ;;  %v4004_v45 = vpop.f32.mrf.mxu1 }
 0x5dd   :  { %v3983_v46 = vpop.f32.mrf.mxu0  ;;  %v4005_v47 = vpop.f32.mrf.mxu1 }
 0x5de   :  { %v3984_v51 = vadd.f32 %v3983_v46, %v3982_v44  ;;  %v4006_v57 = vadd.f32 %v4005_v47, %v4004_v45 }
 0x5df   :  { %v3985_v48 = vpop.f32.mrf.mxu0  ;;  %v4007_v49 = vpop.f32.mrf.mxu1 }
 0x5e0   :  { %v3137_v7 = vadd.f32 %v3984_v51, %v3723_v52 }
 0x5e1   :  { %v3986_v39 = vpop.f32.mrf.mxu0  ;;  %v4008_v50 = vpop.f32.mrf.mxu1 }
 0x5e2   :  { %v3177_v60 = vadd.f32 %v4006_v57, %v3137_v7 }
 0x5fb   :  { %v4026_v53 = vpop.f32.mrf.mxu0  ;;  %v3256_v54 = vpop.f32.mrf.mxu1 }
 0x5fd   :  { %v4027_v59 = vpop.f32.mrf.mxu0  ;;  %v4179_v12 = vpop.f32.mrf.mxu1 }
 0x5fe   :  { %v4028_v61 = vadd.f32 %v4027_v59, %v4026_v53 }
 0x5ff   :  { %v4029_v62 = vpop.f32.mrf.mxu0  ;;  %v3259_v13 = vpop.f32.mrf.mxu1 }
 0x600   :  { %v3217_v15 = vadd.f32 %v4028_v61, %v3177_v60 }
 0x601   :  { %v4030_v16 = vpop.f32.mrf.mxu0  ;;  %v4180_v63 = vpop.f32.mrf.mxu1 }
 0x602   :  { %v3257_v0 = vadd.f32 %v3256_v54, %v3217_v15 }
 0x604   :  { %3262 = vst [vmem:[#allocation2] sm:$0xff] %v3257_v0 }
 0x605   :  { %4547 = shalt.err (!%p4544_p4)
}
 0x606   :  { %3272 = dma.vmem_to_hbm [thread:$0]  %s3270_s17, 128, %s5688_s9, [#allocation3]  }
 0x607   :  { %4556 = dma.done.wait [#allocation3], 128  }
 0x608   :  { %4557 = vsyncadd [#allocation3], 4294967168 }
 0x609   :  { %3276 = vsyncpa [#allocation3], 1 }

</bundles_post_ra>
